<compile_context>
chip_gen: v7x
topology: tpu7x:2x2x1
jax: 0.10.0
libtpu: 0.0.40
codegen_flags: <defaults>
</compile_context>

<pallas_src>
import functools

import jax
import jax.numpy as jnp
from jax import lax
from jax.experimental import pallas as pl
from jax.experimental.pallas import tpu as pltpu

HIDDEN = 50      # LSTM hidden size (per gate)
HP = 128         # per-gate lane width, 128-aligned
GATES = 4
OUT_LANES = 128  # lane-dense readout width


def _pack_params(w_ih, w_hh, b_ih, b_hh, w_lin, b_lin):
    """Repack PyTorch-layout parameters into 128-lane-aligned padded blocks.

    Recurrent weights (prefix and folded-future variants) are returned in bfloat16
    for single-pass MXU matmuls; everything else stays float32. The algebraic folds
    are computed in f32 before the cast.
    """
    H = w_hh.shape[1]

    # Input weights, one row per gate, padded to (1, 4*HP).
    wih_g = w_ih.reshape(GATES, H).astype(jnp.float32)                       # (4, H)
    wih_row = jnp.zeros((GATES, HP), jnp.float32).at[:, :H].set(wih_g)
    wih_row = wih_row.reshape(1, GATES * HP)                                 # (1, 4HP)

    # Recurrent weights transposed (input-major) and padded to (HP, 4*HP).
    whh_g = w_hh.reshape(GATES, H, H).astype(jnp.float32)                    # (gate, out, in)
    whh_t = jnp.transpose(whh_g, (2, 0, 1))                                  # (in, gate, out)
    whh_pad = jnp.zeros((HP, GATES, HP), jnp.float32).at[:H, :, :H].set(whh_t)
    whh_pad = whh_pad.reshape(HP, GATES * HP)                                # (HP, 4HP)

    # Combined bias, padded.
    b_g = (b_ih + b_hh).reshape(GATES, H).astype(jnp.float32)
    b_pad = jnp.zeros((GATES, HP), jnp.float32).at[:, :H].set(b_g)
    b_pad = b_pad.reshape(1, GATES * HP)                                     # (1, 4HP)

    # Readout weight as a lane-dense column block for a single MXU matmul epilogue.
    wlin_row = jnp.zeros((1, HP), jnp.float32).at[:, :H].set(
        w_lin.reshape(1, H).astype(jnp.float32))                             # (1, HP)
    wlin_col = jnp.zeros((HP, OUT_LANES), jnp.float32).at[:H, 0].set(
        w_lin.reshape(H).astype(jnp.float32))                                # (HP, 128)
    blin = b_lin.reshape(1, 1).astype(jnp.float32)                           # (1, 1)

    # Algebraic fold for the autoregressive phase: for t >= T,
    #   x_t = h_{t-1} @ wlin^T + blin, so
    #   z   = h @ (whh + wlin^T wih) + (b + blin * wih)
    whh_fut = whh_pad + wlin_row.T @ wih_row                                 # (HP, 4HP)
    b_fut = b_pad + blin * wih_row                                           # (1, 4HP)

    # bf16 recurrent weights: single MXU pass per step instead of an f32 multi-pass.
    whh_bf = whh_pad.astype(jnp.bfloat16)
    whhf_bf = whh_fut.astype(jnp.bfloat16)

    return wih_row, whh_bf, b_pad, whhf_bf, b_fut, wlin_col, blin


def _make_sinlstm_kernel(T: int, future: int):
    TF = T + future
    G4 = GATES * HP

    def kernel(x_ref, wih_ref, whh_ref, b_ref, whhf_ref, bf_ref, wlin_ref,
               blin_ref, out_ref, hist_ref):
        BP = x_ref.shape[1]

        # Loop-invariant loads / broadcasts hoisted (JAX does not CSE broadcasts).
        wih = wih_ref[...]                                    # (1, 4HP)  f32
        b = jnp.broadcast_to(b_ref[...], (BP, G4))            # (BP, 4HP) f32
        bf = jnp.broadcast_to(bf_ref[...], (BP, G4))          # (BP, 4HP) f32
        whh = whh_ref[...]                                    # (HP, 4HP) bf16
        whhf = whhf_ref[...]                                  # (HP, 4HP) bf16

        def cell(z, c):
            # PyTorch LSTMCell gate order i, f, g, o; each gate is a whole 128-lane
            # block, so these slices are aligned vreg selects.
            # sigmoid(x) = 0.5*(1 + tanh(x/2)): exactly one EUP push per gate.
            i_g = 0.5 * (jnp.tanh(0.5 * z[:, 0 * HP:1 * HP]) + 1.0)
            f_g = 0.5 * (jnp.tanh(0.5 * z[:, 1 * HP:2 * HP]) + 1.0)
            g_g = jnp.tanh(z[:, 2 * HP:3 * HP])
            o_g = 0.5 * (jnp.tanh(0.5 * z[:, 3 * HP:4 * HP]) + 1.0)
            c_new = f_g * c + i_g * g_g
            h_new = o_g * jnp.tanh(c_new)
            return h_new, c_new

        h0 = jnp.zeros((BP, HP), jnp.float32)
        c0 = jnp.zeros((BP, HP), jnp.float32)

        # Capped unroll: full at short trip counts, 8 otherwise (avoids vreg spills).
        unroll_prefix = T if T <= 16 else 8

        def prefix_step(t, carry):
            h, c = carry
            # Input FMA is VPU work hidden under the MXU matmul; recurrent matmul is
            # a single bf16 MXU pass with f32 accumulation.
            z = (x_ref[t] * wih + b
                 + jnp.dot(h.astype(jnp.bfloat16), whh,
                           preferred_element_type=jnp.float32))
            h, c = cell(z, c)
            hist_ref[t] = h           # row-indexed store; readout deferred
            return (h, c)

        carry = lax.fori_loop(0, T, prefix_step, (h0, c0), unroll=unroll_prefix)

        if future > 0:
            unroll_future = future if future <= 16 else 8

            def future_step(k, carry):
                h, c = carry
                # Feedback folded into whhf/bf: no per-step readout or select.
                z = bf + jnp.dot(h.astype(jnp.bfloat16), whhf,
                                 preferred_element_type=jnp.float32)
                h, c = cell(z, c)
                hist_ref[T + k] = h
                return (h, c)

            lax.fori_loop(0, future, future_step, carry, unroll=unroll_future)

        # --- Readout + output store once, off the recurrence: one MXU matmul into a
        # lane-dense (TF*BP, 128) output (column 0 holds the prediction).
        h_all = hist_ref[...].reshape(TF * BP, HP)                      # (TF*BP, HP)
        y = jnp.dot(h_all, wlin_ref[...], preferred_element_type=jnp.float32)
        out_ref[...] = y + blin_ref[...]

    return kernel


@functools.partial(jax.jit, static_argnames=("future",))
def sinlstm_forward(x, w_ih, w_hh, b_ih, b_hh, w_lin, b_lin, future=0):
    """x: (B, T) float32. Returns (B, T + future) float32."""
    B, T = x.shape
    TF = T + future
    BP = max(8, ((B + 7) // 8) * 8)   # pad batch to a full sublane group

    wih_row, whh_bf, b_pad, whhf_bf, b_fut, wlin_col, blin = _pack_params(
        w_ih, w_hh, b_ih, b_hh, w_lin, b_lin)

    # Time-major, batch-padded input, trailing singleton for the lane broadcast.
    x_tb = jnp.zeros((T, BP, 1), jnp.float32).at[:, :B, 0].set(
        jnp.transpose(x).astype(jnp.float32))

    kernel = _make_sinlstm_kernel(T, future)

    out = pl.pallas_call(
        kernel,
        out_shape=jax.ShapeDtypeStruct((TF * BP, OUT_LANES), jnp.float32),
        in_specs=[pl.BlockSpec(memory_space=pltpu.MemorySpace.VMEM)] * 8,
        out_specs=pl.BlockSpec(memory_space=pltpu.MemorySpace.VMEM),
        scratch_shapes=[
            pltpu.VMEM((TF, BP, HP), jnp.float32),          # h_t history
        ],
    )(x_tb, wih_row, whh_bf, b_pad, whhf_bf, b_fut, wlin_col, blin)

    # Column 0 of the lane-dense output holds Linear(h_t); un-pad and batch-major.
    return out[:, 0].reshape(TF, BP)[:, :B].T   # (B, T + future)


def sinlstm_reference(x, w_ih, w_hh, b_ih, b_hh, w_lin, b_lin, future=0):
    """Pure-JAX reference mirroring the PyTorch loop (for correctness check)."""
    B, T = x.shape
    H = HIDDEN
    h = jnp.zeros((B, H), jnp.float32)
    c = jnp.zeros((B, H), jnp.float32)
    outputs = []
    y = jnp.zeros((B, 1), jnp.float32)
    for t in range(T + future):
        x_t = x[:, t:t + 1] if t < T else y
        z = x_t @ w_ih.T + b_ih + h @ w_hh.T + b_hh
        i_g = jax.nn.sigmoid(z[:, 0:H])
        f_g = jax.nn.sigmoid(z[:, H:2 * H])
        g_g = jnp.tanh(z[:, 2 * H:3 * H])
        o_g = jax.nn.sigmoid(z[:, 3 * H:4 * H])
        c = f_g * c + i_g * g_g
        h = o_g * jnp.tanh(c)
        y = h @ w_lin.T + b_lin
        outputs.append(y)
    return jnp.concatenate(outputs, axis=1)


if __name__ == "__main__":
    key = jax.random.PRNGKey(0)
    B, T, future = 2, 8, 4
    H = HIDDEN

    ks = jax.random.split(key, 8)
    bound = 1.0 / jnp.sqrt(H)
    w_ih = jax.random.uniform(ks[0], (4 * H, 1), jnp.float32, -bound, bound)
    w_hh = jax.random.uniform(ks[1], (4 * H, H), jnp.float32, -bound, bound)
    b_ih = jax.random.uniform(ks[2], (4 * H,), jnp.float32, -bound, bound)
    b_hh = jax.random.uniform(ks[3], (4 * H,), jnp.float32, -bound, bound)
    w_lin = jax.random.uniform(ks[4], (1, H), jnp.float32, -bound, bound)
    b_lin = jax.random.uniform(ks[5], (1,), jnp.float32, -bound, bound)

    # Input: a couple of sine-wave snippets, shape (B, T).
    t_axis = jnp.arange(T, dtype=jnp.float32)
    x = jnp.stack([jnp.sin(0.3 * t_axis), jnp.sin(0.3 * t_axis + 1.0)], axis=0)

    out = sinlstm_forward(x, w_ih, w_hh, b_ih, b_hh, w_lin, b_lin, future=future)
    out = jax.block_until_ready(out)

    ref = sinlstm_reference(x, w_ih, w_hh, b_ih, b_hh, w_lin, b_lin, future=future)
    assert out.shape == (B, T + future), out.shape
    # bf16 recurrent weights + the folded autoregressive weights change rounding
    # order vs. the f32 reference and the error compounds over T+future serial
    # steps, hence the ~1e-2 tolerance (vs. 1e-4 for the all-f32 variant).
    assert jnp.allclose(out, ref, atol=2e-2, rtol=2e-2), (out, ref)

    print("KERNEL_OK")
</pallas_src>

<mosaic_0001>
module attributes {stable_mosaic.version = 11 : i64} {
  func.func @kernel(%arg0: memref<8x8x1xf32, #tpu.memory_space<vmem>>, %arg1: memref<1x512xf32, #tpu.memory_space<vmem>>, %arg2: memref<128x512xbf16, #tpu.memory_space<vmem>>, %arg3: memref<1x512xf32, #tpu.memory_space<vmem>>, %arg4: memref<128x512xbf16, #tpu.memory_space<vmem>>, %arg5: memref<1x512xf32, #tpu.memory_space<vmem>>, %arg6: memref<128x128xf32, #tpu.memory_space<vmem>>, %arg7: memref<1x1xf32, #tpu.memory_space<vmem>>, %arg8: memref<96x128xf32, #tpu.memory_space<vmem>>, %arg9: memref<12x8x128xf32, #tpu.memory_space<vmem>>) attributes {dimension_semantics = [], scalar_prefetch = 0 : i64, scratch_operands = 1 : i64, tpu.core_type = #tpu.core_type<tc>} {
    %c0 = arith.constant 0 : index
    %c0_0 = arith.constant 0 : index
    %0 = vector.load %arg1[%c0, %c0_0] : memref<1x512xf32, #tpu.memory_space<vmem>>, vector<1x512xf32>
    %c0_1 = arith.constant 0 : index
    %c0_2 = arith.constant 0 : index
    %1 = vector.load %arg3[%c0_1, %c0_2] : memref<1x512xf32, #tpu.memory_space<vmem>>, vector<1x512xf32>
    %2 = vector.shape_cast %1 : vector<1x512xf32> to vector<1x512xf32>
    %3 = vector.broadcast %2 : vector<1x512xf32> to vector<8x512xf32>
    %c0_3 = arith.constant 0 : index
    %c0_4 = arith.constant 0 : index
    %4 = vector.load %arg5[%c0_3, %c0_4] : memref<1x512xf32, #tpu.memory_space<vmem>>, vector<1x512xf32>
    %5 = vector.shape_cast %4 : vector<1x512xf32> to vector<1x512xf32>
    %6 = vector.broadcast %5 : vector<1x512xf32> to vector<8x512xf32>
    %c0_5 = arith.constant 0 : index
    %c0_6 = arith.constant 0 : index
    %7 = vector.load %arg2[%c0_5, %c0_6] : memref<128x512xbf16, #tpu.memory_space<vmem>>, vector<128x512xbf16>
    %c0_7 = arith.constant 0 : index
    %c0_8 = arith.constant 0 : index
    %8 = vector.load %arg4[%c0_7, %c0_8] : memref<128x512xbf16, #tpu.memory_space<vmem>>, vector<128x512xbf16>
    %cst = arith.constant 0.000000e+00 : f32
    %9 = vector.broadcast %cst : f32 to vector<8x128xf32>
    %cst_9 = arith.constant 0.000000e+00 : f32
    %10 = vector.broadcast %cst_9 : f32 to vector<8x128xf32>
    %c0_i32 = arith.constant 0 : i32
    %11 = arith.index_cast %c0_i32 : i32 to index
    %c0_10 = arith.constant 0 : index
    %c0_11 = arith.constant 0 : index
    %12 = vector.load %arg0[%11, %c0_10, %c0_11] : memref<8x8x1xf32, #tpu.memory_space<vmem>>, vector<1x8x1xf32>
    %13 = vector.shape_cast %12 : vector<1x8x1xf32> to vector<8x1xf32>
    %14 = vector.broadcast %13 : vector<8x1xf32> to vector<8x512xf32>
    %15 = vector.broadcast %0 : vector<1x512xf32> to vector<8x512xf32>
    %16 = arith.mulf %14, %15 : vector<8x512xf32>
    %17 = arith.addf %16, %3 : vector<8x512xf32>
    %18 = arith.truncf %9 : vector<8x128xf32> to vector<8x128xbf16>
    %cst_12 = arith.constant dense<0.000000e+00> : vector<8x512xf32>
    %19 = tpu.matmul %18, %7, %cst_12 {dimension_numbers = #tpu.dot_dimension_numbers<[1], [0], [0], [1], [0, 0, 1, 1], [], []>} : vector<8x128xbf16>, vector<128x512xbf16>, vector<8x512xf32> -> vector<8x512xf32>
    %20 = arith.addf %17, %19 : vector<8x512xf32>
    %21 = vector.extract_strided_slice %20 {offsets = [0, 0], sizes = [8, 128], strides = [1, 1]} : vector<8x512xf32> to vector<8x128xf32>
    %cst_13 = arith.constant 5.000000e-01 : f32
    %22 = vector.broadcast %cst_13 : f32 to vector<8x128xf32>
    %23 = arith.mulf %22, %21 : vector<8x128xf32>
    %24 = math.tanh %23 : vector<8x128xf32>
    %cst_14 = arith.constant 1.000000e+00 : f32
    %25 = vector.broadcast %cst_14 : f32 to vector<8x128xf32>
    %26 = arith.addf %24, %25 : vector<8x128xf32>
    %cst_15 = arith.constant 5.000000e-01 : f32
    %27 = vector.broadcast %cst_15 : f32 to vector<8x128xf32>
    %28 = arith.mulf %27, %26 : vector<8x128xf32>
    %29 = vector.extract_strided_slice %20 {offsets = [0, 128], sizes = [8, 128], strides = [1, 1]} : vector<8x512xf32> to vector<8x128xf32>
    %cst_16 = arith.constant 5.000000e-01 : f32
    %30 = vector.broadcast %cst_16 : f32 to vector<8x128xf32>
    %31 = arith.mulf %30, %29 : vector<8x128xf32>
    %32 = math.tanh %31 : vector<8x128xf32>
    %cst_17 = arith.constant 1.000000e+00 : f32
    %33 = vector.broadcast %cst_17 : f32 to vector<8x128xf32>
    %34 = arith.addf %32, %33 : vector<8x128xf32>
    %cst_18 = arith.constant 5.000000e-01 : f32
    %35 = vector.broadcast %cst_18 : f32 to vector<8x128xf32>
    %36 = arith.mulf %35, %34 : vector<8x128xf32>
    %37 = vector.extract_strided_slice %20 {offsets = [0, 256], sizes = [8, 128], strides = [1, 1]} : vector<8x512xf32> to vector<8x128xf32>
    %38 = math.tanh %37 : vector<8x128xf32>
    %39 = vector.extract_strided_slice %20 {offsets = [0, 384], sizes = [8, 128], strides = [1, 1]} : vector<8x512xf32> to vector<8x128xf32>
    %cst_19 = arith.constant 5.000000e-01 : f32
    %40 = vector.broadcast %cst_19 : f32 to vector<8x128xf32>
    %41 = arith.mulf %40, %39 : vector<8x128xf32>
    %42 = math.tanh %41 : vector<8x128xf32>
    %cst_20 = arith.constant 1.000000e+00 : f32
    %43 = vector.broadcast %cst_20 : f32 to vector<8x128xf32>
    %44 = arith.addf %42, %43 : vector<8x128xf32>
    %cst_21 = arith.constant 5.000000e-01 : f32
    %45 = vector.broadcast %cst_21 : f32 to vector<8x128xf32>
    %46 = arith.mulf %45, %44 : vector<8x128xf32>
    %47 = arith.mulf %36, %10 : vector<8x128xf32>
    %48 = arith.mulf %28, %38 : vector<8x128xf32>
    %49 = arith.addf %47, %48 : vector<8x128xf32>
    %50 = math.tanh %49 : vector<8x128xf32>
    %51 = arith.mulf %46, %50 : vector<8x128xf32>
    %52 = arith.index_cast %c0_i32 : i32 to index
    %c0_22 = arith.constant 0 : index
    %c0_23 = arith.constant 0 : index
    %53 = vector.load %arg9[%52, %c0_22, %c0_23] : memref<12x8x128xf32, #tpu.memory_space<vmem>>, vector<1x8x128xf32>
    %54 = vector.shape_cast %53 : vector<1x8x128xf32> to vector<8x128xf32>
    %55 = vector.shape_cast %51 : vector<8x128xf32> to vector<1x8x128xf32>
    tpu.vector_store %arg9[%52, %c0_22, %c0_23], %55 {strides = array<i32>} : memref<12x8x128xf32, #tpu.memory_space<vmem>>, vector<1x8x128xf32>,
    %c1_i32 = arith.constant 1 : i32
    %56 = arith.index_cast %c1_i32 : i32 to index
    %c0_24 = arith.constant 0 : index
    %c0_25 = arith.constant 0 : index
    %57 = vector.load %arg0[%56, %c0_24, %c0_25] : memref<8x8x1xf32, #tpu.memory_space<vmem>>, vector<1x8x1xf32>
    %58 = vector.shape_cast %57 : vector<1x8x1xf32> to vector<8x1xf32>
    %59 = vector.broadcast %58 : vector<8x1xf32> to vector<8x512xf32>
    %60 = vector.broadcast %0 : vector<1x512xf32> to vector<8x512xf32>
    %61 = arith.mulf %59, %60 : vector<8x512xf32>
    %62 = arith.addf %61, %3 : vector<8x512xf32>
    %63 = arith.truncf %51 : vector<8x128xf32> to vector<8x128xbf16>
    %cst_26 = arith.constant dense<0.000000e+00> : vector<8x512xf32>
    %64 = tpu.matmul %63, %7, %cst_26 {dimension_numbers = #tpu.dot_dimension_numbers<[1], [0], [0], [1], [0, 0, 1, 1], [], []>} : vector<8x128xbf16>, vector<128x512xbf16>, vector<8x512xf32> -> vector<8x512xf32>
    %65 = arith.addf %62, %64 : vector<8x512xf32>
    %66 = vector.extract_strided_slice %65 {offsets = [0, 0], sizes = [8, 128], strides = [1, 1]} : vector<8x512xf32> to vector<8x128xf32>
    %cst_27 = arith.constant 5.000000e-01 : f32
    %67 = vector.broadcast %cst_27 : f32 to vector<8x128xf32>
    %68 = arith.mulf %67, %66 : vector<8x128xf32>
    %69 = math.tanh %68 : vector<8x128xf32>
    %cst_28 = arith.constant 1.000000e+00 : f32
    %70 = vector.broadcast %cst_28 : f32 to vector<8x128xf32>
    %71 = arith.addf %69, %70 : vector<8x128xf32>
    %cst_29 = arith.constant 5.000000e-01 : f32
    %72 = vector.broadcast %cst_29 : f32 to vector<8x128xf32>
    %73 = arith.mulf %72, %71 : vector<8x128xf32>
    %74 = vector.extract_strided_slice %65 {offsets = [0, 128], sizes = [8, 128], strides = [1, 1]} : vector<8x512xf32> to vector<8x128xf32>
    %cst_30 = arith.constant 5.000000e-01 : f32
    %75 = vector.broadcast %cst_30 : f32 to vector<8x128xf32>
    %76 = arith.mulf %75, %74 : vector<8x128xf32>
    %77 = math.tanh %76 : vector<8x128xf32>
    %cst_31 = arith.constant 1.000000e+00 : f32
    %78 = vector.broadcast %cst_31 : f32 to vector<8x128xf32>
    %79 = arith.addf %77, %78 : vector<8x128xf32>
    %cst_32 = arith.constant 5.000000e-01 : f32
    %80 = vector.broadcast %cst_32 : f32 to vector<8x128xf32>
    %81 = arith.mulf %80, %79 : vector<8x128xf32>
    %82 = vector.extract_strided_slice %65 {offsets = [0, 256], sizes = [8, 128], strides = [1, 1]} : vector<8x512xf32> to vector<8x128xf32>
    %83 = math.tanh %82 : vector<8x128xf32>
    %84 = vector.extract_strided_slice %65 {offsets = [0, 384], sizes = [8, 128], strides = [1, 1]} : vector<8x512xf32> to vector<8x128xf32>
    %cst_33 = arith.constant 5.000000e-01 : f32
    %85 = vector.broadcast %cst_33 : f32 to vector<8x128xf32>
    %86 = arith.mulf %85, %84 : vector<8x128xf32>
    %87 = math.tanh %86 : vector<8x128xf32>
    %cst_34 = arith.constant 1.000000e+00 : f32
    %88 = vector.broadcast %cst_34 : f32 to vector<8x128xf32>
    %89 = arith.addf %87, %88 : vector<8x128xf32>
    %cst_35 = arith.constant 5.000000e-01 : f32
    %90 = vector.broadcast %cst_35 : f32 to vector<8x128xf32>
    %91 = arith.mulf %90, %89 : vector<8x128xf32>
    %92 = arith.mulf %81, %49 : vector<8x128xf32>
    %93 = arith.mulf %73, %83 : vector<8x128xf32>
    %94 = arith.addf %92, %93 : vector<8x128xf32>
    %95 = math.tanh %94 : vector<8x128xf32>
    %96 = arith.mulf %91, %95 : vector<8x128xf32>
    %97 = arith.index_cast %c1_i32 : i32 to index
    %c0_36 = arith.constant 0 : index
    %c0_37 = arith.constant 0 : index
    %98 = vector.load %arg9[%97, %c0_36, %c0_37] : memref<12x8x128xf32, #tpu.memory_space<vmem>>, vector<1x8x128xf32>
    %99 = vector.shape_cast %98 : vector<1x8x128xf32> to vector<8x128xf32>
    %100 = vector.shape_cast %96 : vector<8x128xf32> to vector<1x8x128xf32>
    tpu.vector_store %arg9[%97, %c0_36, %c0_37], %100 {strides = array<i32>} : memref<12x8x128xf32, #tpu.memory_space<vmem>>, vector<1x8x128xf32>,
    %c2_i32 = arith.constant 2 : i32
    %101 = arith.index_cast %c2_i32 : i32 to index
    %c0_38 = arith.constant 0 : index
    %c0_39 = arith.constant 0 : index
    %102 = vector.load %arg0[%101, %c0_38, %c0_39] : memref<8x8x1xf32, #tpu.memory_space<vmem>>, vector<1x8x1xf32>
    %103 = vector.shape_cast %102 : vector<1x8x1xf32> to vector<8x1xf32>
    %104 = vector.broadcast %103 : vector<8x1xf32> to vector<8x512xf32>
    %105 = vector.broadcast %0 : vector<1x512xf32> to vector<8x512xf32>
    %106 = arith.mulf %104, %105 : vector<8x512xf32>
    %107 = arith.addf %106, %3 : vector<8x512xf32>
    %108 = arith.truncf %96 : vector<8x128xf32> to vector<8x128xbf16>
    %cst_40 = arith.constant dense<0.000000e+00> : vector<8x512xf32>
    %109 = tpu.matmul %108, %7, %cst_40 {dimension_numbers = #tpu.dot_dimension_numbers<[1], [0], [0], [1], [0, 0, 1, 1], [], []>} : vector<8x128xbf16>, vector<128x512xbf16>, vector<8x512xf32> -> vector<8x512xf32>
    %110 = arith.addf %107, %109 : vector<8x512xf32>
    %111 = vector.extract_strided_slice %110 {offsets = [0, 0], sizes = [8, 128], strides = [1, 1]} : vector<8x512xf32> to vector<8x128xf32>
    %cst_41 = arith.constant 5.000000e-01 : f32
    %112 = vector.broadcast %cst_41 : f32 to vector<8x128xf32>
    %113 = arith.mulf %112, %111 : vector<8x128xf32>
    %114 = math.tanh %113 : vector<8x128xf32>
    %cst_42 = arith.constant 1.000000e+00 : f32
    %115 = vector.broadcast %cst_42 : f32 to vector<8x128xf32>
    %116 = arith.addf %114, %115 : vector<8x128xf32>
    %cst_43 = arith.constant 5.000000e-01 : f32
    %117 = vector.broadcast %cst_43 : f32 to vector<8x128xf32>
    %118 = arith.mulf %117, %116 : vector<8x128xf32>
    %119 = vector.extract_strided_slice %110 {offsets = [0, 128], sizes = [8, 128], strides = [1, 1]} : vector<8x512xf32> to vector<8x128xf32>
    %cst_44 = arith.constant 5.000000e-01 : f32
    %120 = vector.broadcast %cst_44 : f32 to vector<8x128xf32>
    %121 = arith.mulf %120, %119 : vector<8x128xf32>
    %122 = math.tanh %121 : vector<8x128xf32>
    %cst_45 = arith.constant 1.000000e+00 : f32
    %123 = vector.broadcast %cst_45 : f32 to vector<8x128xf32>
    %124 = arith.addf %122, %123 : vector<8x128xf32>
    %cst_46 = arith.constant 5.000000e-01 : f32
    %125 = vector.broadcast %cst_46 : f32 to vector<8x128xf32>
    %126 = arith.mulf %125, %124 : vector<8x128xf32>
    %127 = vector.extract_strided_slice %110 {offsets = [0, 256], sizes = [8, 128], strides = [1, 1]} : vector<8x512xf32> to vector<8x128xf32>
    %128 = math.tanh %127 : vector<8x128xf32>
    %129 = vector.extract_strided_slice %110 {offsets = [0, 384], sizes = [8, 128], strides = [1, 1]} : vector<8x512xf32> to vector<8x128xf32>
    %cst_47 = arith.constant 5.000000e-01 : f32
    %130 = vector.broadcast %cst_47 : f32 to vector<8x128xf32>
    %131 = arith.mulf %130, %129 : vector<8x128xf32>
    %132 = math.tanh %131 : vector<8x128xf32>
    %cst_48 = arith.constant 1.000000e+00 : f32
    %133 = vector.broadcast %cst_48 : f32 to vector<8x128xf32>
    %134 = arith.addf %132, %133 : vector<8x128xf32>
    %cst_49 = arith.constant 5.000000e-01 : f32
    %135 = vector.broadcast %cst_49 : f32 to vector<8x128xf32>
    %136 = arith.mulf %135, %134 : vector<8x128xf32>
    %137 = arith.mulf %126, %94 : vector<8x128xf32>
    %138 = arith.mulf %118, %128 : vector<8x128xf32>
    %139 = arith.addf %137, %138 : vector<8x128xf32>
    %140 = math.tanh %139 : vector<8x128xf32>
    %141 = arith.mulf %136, %140 : vector<8x128xf32>
    %142 = arith.index_cast %c2_i32 : i32 to index
    %c0_50 = arith.constant 0 : index
    %c0_51 = arith.constant 0 : index
    %143 = vector.load %arg9[%142, %c0_50, %c0_51] : memref<12x8x128xf32, #tpu.memory_space<vmem>>, vector<1x8x128xf32>
    %144 = vector.shape_cast %143 : vector<1x8x128xf32> to vector<8x128xf32>
    %145 = vector.shape_cast %141 : vector<8x128xf32> to vector<1x8x128xf32>
    tpu.vector_store %arg9[%142, %c0_50, %c0_51], %145 {strides = array<i32>} : memref<12x8x128xf32, #tpu.memory_space<vmem>>, vector<1x8x128xf32>,
    %c3_i32 = arith.constant 3 : i32
    %146 = arith.index_cast %c3_i32 : i32 to index
    %c0_52 = arith.constant 0 : index
    %c0_53 = arith.constant 0 : index
    %147 = vector.load %arg0[%146, %c0_52, %c0_53] : memref<8x8x1xf32, #tpu.memory_space<vmem>>, vector<1x8x1xf32>
    %148 = vector.shape_cast %147 : vector<1x8x1xf32> to vector<8x1xf32>
    %149 = vector.broadcast %148 : vector<8x1xf32> to vector<8x512xf32>
    %150 = vector.broadcast %0 : vector<1x512xf32> to vector<8x512xf32>
    %151 = arith.mulf %149, %150 : vector<8x512xf32>
    %152 = arith.addf %151, %3 : vector<8x512xf32>
    %153 = arith.truncf %141 : vector<8x128xf32> to vector<8x128xbf16>
    %cst_54 = arith.constant dense<0.000000e+00> : vector<8x512xf32>
    %154 = tpu.matmul %153, %7, %cst_54 {dimension_numbers = #tpu.dot_dimension_numbers<[1], [0], [0], [1], [0, 0, 1, 1], [], []>} : vector<8x128xbf16>, vector<128x512xbf16>, vector<8x512xf32> -> vector<8x512xf32>
    %155 = arith.addf %152, %154 : vector<8x512xf32>
    %156 = vector.extract_strided_slice %155 {offsets = [0, 0], sizes = [8, 128], strides = [1, 1]} : vector<8x512xf32> to vector<8x128xf32>
    %cst_55 = arith.constant 5.000000e-01 : f32
    %157 = vector.broadcast %cst_55 : f32 to vector<8x128xf32>
    %158 = arith.mulf %157, %156 : vector<8x128xf32>
    %159 = math.tanh %158 : vector<8x128xf32>
    %cst_56 = arith.constant 1.000000e+00 : f32
    %160 = vector.broadcast %cst_56 : f32 to vector<8x128xf32>
    %161 = arith.addf %159, %160 : vector<8x128xf32>
    %cst_57 = arith.constant 5.000000e-01 : f32
    %162 = vector.broadcast %cst_57 : f32 to vector<8x128xf32>
    %163 = arith.mulf %162, %161 : vector<8x128xf32>
    %164 = vector.extract_strided_slice %155 {offsets = [0, 128], sizes = [8, 128], strides = [1, 1]} : vector<8x512xf32> to vector<8x128xf32>
    %cst_58 = arith.constant 5.000000e-01 : f32
    %165 = vector.broadcast %cst_58 : f32 to vector<8x128xf32>
    %166 = arith.mulf %165, %164 : vector<8x128xf32>
    %167 = math.tanh %166 : vector<8x128xf32>
    %cst_59 = arith.constant 1.000000e+00 : f32
    %168 = vector.broadcast %cst_59 : f32 to vector<8x128xf32>
    %169 = arith.addf %167, %168 : vector<8x128xf32>
    %cst_60 = arith.constant 5.000000e-01 : f32
    %170 = vector.broadcast %cst_60 : f32 to vector<8x128xf32>
    %171 = arith.mulf %170, %169 : vector<8x128xf32>
    %172 = vector.extract_strided_slice %155 {offsets = [0, 256], sizes = [8, 128], strides = [1, 1]} : vector<8x512xf32> to vector<8x128xf32>
    %173 = math.tanh %172 : vector<8x128xf32>
    %174 = vector.extract_strided_slice %155 {offsets = [0, 384], sizes = [8, 128], strides = [1, 1]} : vector<8x512xf32> to vector<8x128xf32>
    %cst_61 = arith.constant 5.000000e-01 : f32
    %175 = vector.broadcast %cst_61 : f32 to vector<8x128xf32>
    %176 = arith.mulf %175, %174 : vector<8x128xf32>
    %177 = math.tanh %176 : vector<8x128xf32>
    %cst_62 = arith.constant 1.000000e+00 : f32
    %178 = vector.broadcast %cst_62 : f32 to vector<8x128xf32>
    %179 = arith.addf %177, %178 : vector<8x128xf32>
    %cst_63 = arith.constant 5.000000e-01 : f32
    %180 = vector.broadcast %cst_63 : f32 to vector<8x128xf32>
    %181 = arith.mulf %180, %179 : vector<8x128xf32>
    %182 = arith.mulf %171, %139 : vector<8x128xf32>
    %183 = arith.mulf %163, %173 : vector<8x128xf32>
    %184 = arith.addf %182, %183 : vector<8x128xf32>
    %185 = math.tanh %184 : vector<8x128xf32>
    %186 = arith.mulf %181, %185 : vector<8x128xf32>
    %187 = arith.index_cast %c3_i32 : i32 to index
    %c0_64 = arith.constant 0 : index
    %c0_65 = arith.constant 0 : index
    %188 = vector.load %arg9[%187, %c0_64, %c0_65] : memref<12x8x128xf32, #tpu.memory_space<vmem>>, vector<1x8x128xf32>
    %189 = vector.shape_cast %188 : vector<1x8x128xf32> to vector<8x128xf32>
    %190 = vector.shape_cast %186 : vector<8x128xf32> to vector<1x8x128xf32>
    tpu.vector_store %arg9[%187, %c0_64, %c0_65], %190 {strides = array<i32>} : memref<12x8x128xf32, #tpu.memory_space<vmem>>, vector<1x8x128xf32>,
    %c4_i32 = arith.constant 4 : i32
    %191 = arith.index_cast %c4_i32 : i32 to index
    %c0_66 = arith.constant 0 : index
    %c0_67 = arith.constant 0 : index
    %192 = vector.load %arg0[%191, %c0_66, %c0_67] : memref<8x8x1xf32, #tpu.memory_space<vmem>>, vector<1x8x1xf32>
    %193 = vector.shape_cast %192 : vector<1x8x1xf32> to vector<8x1xf32>
    %194 = vector.broadcast %193 : vector<8x1xf32> to vector<8x512xf32>
    %195 = vector.broadcast %0 : vector<1x512xf32> to vector<8x512xf32>
    %196 = arith.mulf %194, %195 : vector<8x512xf32>
    %197 = arith.addf %196, %3 : vector<8x512xf32>
    %198 = arith.truncf %186 : vector<8x128xf32> to vector<8x128xbf16>
    %cst_68 = arith.constant dense<0.000000e+00> : vector<8x512xf32>
    %199 = tpu.matmul %198, %7, %cst_68 {dimension_numbers = #tpu.dot_dimension_numbers<[1], [0], [0], [1], [0, 0, 1, 1], [], []>} : vector<8x128xbf16>, vector<128x512xbf16>, vector<8x512xf32> -> vector<8x512xf32>
    %200 = arith.addf %197, %199 : vector<8x512xf32>
    %201 = vector.extract_strided_slice %200 {offsets = [0, 0], sizes = [8, 128], strides = [1, 1]} : vector<8x512xf32> to vector<8x128xf32>
    %cst_69 = arith.constant 5.000000e-01 : f32
    %202 = vector.broadcast %cst_69 : f32 to vector<8x128xf32>
    %203 = arith.mulf %202, %201 : vector<8x128xf32>
    %204 = math.tanh %203 : vector<8x128xf32>
    %cst_70 = arith.constant 1.000000e+00 : f32
    %205 = vector.broadcast %cst_70 : f32 to vector<8x128xf32>
    %206 = arith.addf %204, %205 : vector<8x128xf32>
    %cst_71 = arith.constant 5.000000e-01 : f32
    %207 = vector.broadcast %cst_71 : f32 to vector<8x128xf32>
    %208 = arith.mulf %207, %206 : vector<8x128xf32>
    %209 = vector.extract_strided_slice %200 {offsets = [0, 128], sizes = [8, 128], strides = [1, 1]} : vector<8x512xf32> to vector<8x128xf32>
    %cst_72 = arith.constant 5.000000e-01 : f32
    %210 = vector.broadcast %cst_72 : f32 to vector<8x128xf32>
    %211 = arith.mulf %210, %209 : vector<8x128xf32>
    %212 = math.tanh %211 : vector<8x128xf32>
    %cst_73 = arith.constant 1.000000e+00 : f32
    %213 = vector.broadcast %cst_73 : f32 to vector<8x128xf32>
    %214 = arith.addf %212, %213 : vector<8x128xf32>
    %cst_74 = arith.constant 5.000000e-01 : f32
    %215 = vector.broadcast %cst_74 : f32 to vector<8x128xf32>
    %216 = arith.mulf %215, %214 : vector<8x128xf32>
    %217 = vector.extract_strided_slice %200 {offsets = [0, 256], sizes = [8, 128], strides = [1, 1]} : vector<8x512xf32> to vector<8x128xf32>
    %218 = math.tanh %217 : vector<8x128xf32>
    %219 = vector.extract_strided_slice %200 {offsets = [0, 384], sizes = [8, 128], strides = [1, 1]} : vector<8x512xf32> to vector<8x128xf32>
    %cst_75 = arith.constant 5.000000e-01 : f32
    %220 = vector.broadcast %cst_75 : f32 to vector<8x128xf32>
    %221 = arith.mulf %220, %219 : vector<8x128xf32>
    %222 = math.tanh %221 : vector<8x128xf32>
    %cst_76 = arith.constant 1.000000e+00 : f32
    %223 = vector.broadcast %cst_76 : f32 to vector<8x128xf32>
    %224 = arith.addf %222, %223 : vector<8x128xf32>
    %cst_77 = arith.constant 5.000000e-01 : f32
    %225 = vector.broadcast %cst_77 : f32 to vector<8x128xf32>
    %226 = arith.mulf %225, %224 : vector<8x128xf32>
    %227 = arith.mulf %216, %184 : vector<8x128xf32>
    %228 = arith.mulf %208, %218 : vector<8x128xf32>
    %229 = arith.addf %227, %228 : vector<8x128xf32>
    %230 = math.tanh %229 : vector<8x128xf32>
    %231 = arith.mulf %226, %230 : vector<8x128xf32>
    %232 = arith.index_cast %c4_i32 : i32 to index
    %c0_78 = arith.constant 0 : index
    %c0_79 = arith.constant 0 : index
    %233 = vector.load %arg9[%232, %c0_78, %c0_79] : memref<12x8x128xf32, #tpu.memory_space<vmem>>, vector<1x8x128xf32>
    %234 = vector.shape_cast %233 : vector<1x8x128xf32> to vector<8x128xf32>
    %235 = vector.shape_cast %231 : vector<8x128xf32> to vector<1x8x128xf32>
    tpu.vector_store %arg9[%232, %c0_78, %c0_79], %235 {strides = array<i32>} : memref<12x8x128xf32, #tpu.memory_space<vmem>>, vector<1x8x128xf32>,
    %c5_i32 = arith.constant 5 : i32
    %236 = arith.index_cast %c5_i32 : i32 to index
    %c0_80 = arith.constant 0 : index
    %c0_81 = arith.constant 0 : index
    %237 = vector.load %arg0[%236, %c0_80, %c0_81] : memref<8x8x1xf32, #tpu.memory_space<vmem>>, vector<1x8x1xf32>
    %238 = vector.shape_cast %237 : vector<1x8x1xf32> to vector<8x1xf32>
    %239 = vector.broadcast %238 : vector<8x1xf32> to vector<8x512xf32>
    %240 = vector.broadcast %0 : vector<1x512xf32> to vector<8x512xf32>
    %241 = arith.mulf %239, %240 : vector<8x512xf32>
    %242 = arith.addf %241, %3 : vector<8x512xf32>
    %243 = arith.truncf %231 : vector<8x128xf32> to vector<8x128xbf16>
    %cst_82 = arith.constant dense<0.000000e+00> : vector<8x512xf32>
    %244 = tpu.matmul %243, %7, %cst_82 {dimension_numbers = #tpu.dot_dimension_numbers<[1], [0], [0], [1], [0, 0, 1, 1], [], []>} : vector<8x128xbf16>, vector<128x512xbf16>, vector<8x512xf32> -> vector<8x512xf32>
    %245 = arith.addf %242, %244 : vector<8x512xf32>
    %246 = vector.extract_strided_slice %245 {offsets = [0, 0], sizes = [8, 128], strides = [1, 1]} : vector<8x512xf32> to vector<8x128xf32>
    %cst_83 = arith.constant 5.000000e-01 : f32
    %247 = vector.broadcast %cst_83 : f32 to vector<8x128xf32>
    %248 = arith.mulf %247, %246 : vector<8x128xf32>
    %249 = math.tanh %248 : vector<8x128xf32>
    %cst_84 = arith.constant 1.000000e+00 : f32
    %250 = vector.broadcast %cst_84 : f32 to vector<8x128xf32>
    %251 = arith.addf %249, %250 : vector<8x128xf32>
    %cst_85 = arith.constant 5.000000e-01 : f32
    %252 = vector.broadcast %cst_85 : f32 to vector<8x128xf32>
    %253 = arith.mulf %252, %251 : vector<8x128xf32>
    %254 = vector.extract_strided_slice %245 {offsets = [0, 128], sizes = [8, 128], strides = [1, 1]} : vector<8x512xf32> to vector<8x128xf32>
    %cst_86 = arith.constant 5.000000e-01 : f32
    %255 = vector.broadcast %cst_86 : f32 to vector<8x128xf32>
    %256 = arith.mulf %255, %254 : vector<8x128xf32>
    %257 = math.tanh %256 : vector<8x128xf32>
    %cst_87 = arith.constant 1.000000e+00 : f32
    %258 = vector.broadcast %cst_87 : f32 to vector<8x128xf32>
    %259 = arith.addf %257, %258 : vector<8x128xf32>
    %cst_88 = arith.constant 5.000000e-01 : f32
    %260 = vector.broadcast %cst_88 : f32 to vector<8x128xf32>
    %261 = arith.mulf %260, %259 : vector<8x128xf32>
    %262 = vector.extract_strided_slice %245 {offsets = [0, 256], sizes = [8, 128], strides = [1, 1]} : vector<8x512xf32> to vector<8x128xf32>
    %263 = math.tanh %262 : vector<8x128xf32>
    %264 = vector.extract_strided_slice %245 {offsets = [0, 384], sizes = [8, 128], strides = [1, 1]} : vector<8x512xf32> to vector<8x128xf32>
    %cst_89 = arith.constant 5.000000e-01 : f32
    %265 = vector.broadcast %cst_89 : f32 to vector<8x128xf32>
    %266 = arith.mulf %265, %264 : vector<8x128xf32>
    %267 = math.tanh %266 : vector<8x128xf32>
    %cst_90 = arith.constant 1.000000e+00 : f32
    %268 = vector.broadcast %cst_90 : f32 to vector<8x128xf32>
    %269 = arith.addf %267, %268 : vector<8x128xf32>
    %cst_91 = arith.constant 5.000000e-01 : f32
    %270 = vector.broadcast %cst_91 : f32 to vector<8x128xf32>
    %271 = arith.mulf %270, %269 : vector<8x128xf32>
    %272 = arith.mulf %261, %229 : vector<8x128xf32>
    %273 = arith.mulf %253, %263 : vector<8x128xf32>
    %274 = arith.addf %272, %273 : vector<8x128xf32>
    %275 = math.tanh %274 : vector<8x128xf32>
    %276 = arith.mulf %271, %275 : vector<8x128xf32>
    %277 = arith.index_cast %c5_i32 : i32 to index
    %c0_92 = arith.constant 0 : index
    %c0_93 = arith.constant 0 : index
    %278 = vector.load %arg9[%277, %c0_92, %c0_93] : memref<12x8x128xf32, #tpu.memory_space<vmem>>, vector<1x8x128xf32>
    %279 = vector.shape_cast %278 : vector<1x8x128xf32> to vector<8x128xf32>
    %280 = vector.shape_cast %276 : vector<8x128xf32> to vector<1x8x128xf32>
    tpu.vector_store %arg9[%277, %c0_92, %c0_93], %280 {strides = array<i32>} : memref<12x8x128xf32, #tpu.memory_space<vmem>>, vector<1x8x128xf32>,
    %c6_i32 = arith.constant 6 : i32
    %281 = arith.index_cast %c6_i32 : i32 to index
    %c0_94 = arith.constant 0 : index
    %c0_95 = arith.constant 0 : index
    %282 = vector.load %arg0[%281, %c0_94, %c0_95] : memref<8x8x1xf32, #tpu.memory_space<vmem>>, vector<1x8x1xf32>
    %283 = vector.shape_cast %282 : vector<1x8x1xf32> to vector<8x1xf32>
    %284 = vector.broadcast %283 : vector<8x1xf32> to vector<8x512xf32>
    %285 = vector.broadcast %0 : vector<1x512xf32> to vector<8x512xf32>
    %286 = arith.mulf %284, %285 : vector<8x512xf32>
    %287 = arith.addf %286, %3 : vector<8x512xf32>
    %288 = arith.truncf %276 : vector<8x128xf32> to vector<8x128xbf16>
    %cst_96 = arith.constant dense<0.000000e+00> : vector<8x512xf32>
    %289 = tpu.matmul %288, %7, %cst_96 {dimension_numbers = #tpu.dot_dimension_numbers<[1], [0], [0], [1], [0, 0, 1, 1], [], []>} : vector<8x128xbf16>, vector<128x512xbf16>, vector<8x512xf32> -> vector<8x512xf32>
    %290 = arith.addf %287, %289 : vector<8x512xf32>
    %291 = vector.extract_strided_slice %290 {offsets = [0, 0], sizes = [8, 128], strides = [1, 1]} : vector<8x512xf32> to vector<8x128xf32>
    %cst_97 = arith.constant 5.000000e-01 : f32
    %292 = vector.broadcast %cst_97 : f32 to vector<8x128xf32>
    %293 = arith.mulf %292, %291 : vector<8x128xf32>
    %294 = math.tanh %293 : vector<8x128xf32>
    %cst_98 = arith.constant 1.000000e+00 : f32
    %295 = vector.broadcast %cst_98 : f32 to vector<8x128xf32>
    %296 = arith.addf %294, %295 : vector<8x128xf32>
    %cst_99 = arith.constant 5.000000e-01 : f32
    %297 = vector.broadcast %cst_99 : f32 to vector<8x128xf32>
    %298 = arith.mulf %297, %296 : vector<8x128xf32>
    %299 = vector.extract_strided_slice %290 {offsets = [0, 128], sizes = [8, 128], strides = [1, 1]} : vector<8x512xf32> to vector<8x128xf32>
    %cst_100 = arith.constant 5.000000e-01 : f32
    %300 = vector.broadcast %cst_100 : f32 to vector<8x128xf32>
    %301 = arith.mulf %300, %299 : vector<8x128xf32>
    %302 = math.tanh %301 : vector<8x128xf32>
    %cst_101 = arith.constant 1.000000e+00 : f32
    %303 = vector.broadcast %cst_101 : f32 to vector<8x128xf32>
    %304 = arith.addf %302, %303 : vector<8x128xf32>
    %cst_102 = arith.constant 5.000000e-01 : f32
    %305 = vector.broadcast %cst_102 : f32 to vector<8x128xf32>
    %306 = arith.mulf %305, %304 : vector<8x128xf32>
    %307 = vector.extract_strided_slice %290 {offsets = [0, 256], sizes = [8, 128], strides = [1, 1]} : vector<8x512xf32> to vector<8x128xf32>
    %308 = math.tanh %307 : vector<8x128xf32>
    %309 = vector.extract_strided_slice %290 {offsets = [0, 384], sizes = [8, 128], strides = [1, 1]} : vector<8x512xf32> to vector<8x128xf32>
    %cst_103 = arith.constant 5.000000e-01 : f32
    %310 = vector.broadcast %cst_103 : f32 to vector<8x128xf32>
    %311 = arith.mulf %310, %309 : vector<8x128xf32>
    %312 = math.tanh %311 : vector<8x128xf32>
    %cst_104 = arith.constant 1.000000e+00 : f32
    %313 = vector.broadcast %cst_104 : f32 to vector<8x128xf32>
    %314 = arith.addf %312, %313 : vector<8x128xf32>
    %cst_105 = arith.constant 5.000000e-01 : f32
    %315 = vector.broadcast %cst_105 : f32 to vector<8x128xf32>
    %316 = arith.mulf %315, %314 : vector<8x128xf32>
    %317 = arith.mulf %306, %274 : vector<8x128xf32>
    %318 = arith.mulf %298, %308 : vector<8x128xf32>
    %319 = arith.addf %317, %318 : vector<8x128xf32>
    %320 = math.tanh %319 : vector<8x128xf32>
    %321 = arith.mulf %316, %320 : vector<8x128xf32>
    %322 = arith.index_cast %c6_i32 : i32 to index
    %c0_106 = arith.constant 0 : index
    %c0_107 = arith.constant 0 : index
    %323 = vector.load %arg9[%322, %c0_106, %c0_107] : memref<12x8x128xf32, #tpu.memory_space<vmem>>, vector<1x8x128xf32>
    %324 = vector.shape_cast %323 : vector<1x8x128xf32> to vector<8x128xf32>
    %325 = vector.shape_cast %321 : vector<8x128xf32> to vector<1x8x128xf32>
    tpu.vector_store %arg9[%322, %c0_106, %c0_107], %325 {strides = array<i32>} : memref<12x8x128xf32, #tpu.memory_space<vmem>>, vector<1x8x128xf32>,
    %c7_i32 = arith.constant 7 : i32
    %326 = arith.index_cast %c7_i32 : i32 to index
    %c0_108 = arith.constant 0 : index
    %c0_109 = arith.constant 0 : index
    %327 = vector.load %arg0[%326, %c0_108, %c0_109] : memref<8x8x1xf32, #tpu.memory_space<vmem>>, vector<1x8x1xf32>
    %328 = vector.shape_cast %327 : vector<1x8x1xf32> to vector<8x1xf32>
    %329 = vector.broadcast %328 : vector<8x1xf32> to vector<8x512xf32>
    %330 = vector.broadcast %0 : vector<1x512xf32> to vector<8x512xf32>
    %331 = arith.mulf %329, %330 : vector<8x512xf32>
    %332 = arith.addf %331, %3 : vector<8x512xf32>
    %333 = arith.truncf %321 : vector<8x128xf32> to vector<8x128xbf16>
    %cst_110 = arith.constant dense<0.000000e+00> : vector<8x512xf32>
    %334 = tpu.matmul %333, %7, %cst_110 {dimension_numbers = #tpu.dot_dimension_numbers<[1], [0], [0], [1], [0, 0, 1, 1], [], []>} : vector<8x128xbf16>, vector<128x512xbf16>, vector<8x512xf32> -> vector<8x512xf32>
    %335 = arith.addf %332, %334 : vector<8x512xf32>
    %336 = vector.extract_strided_slice %335 {offsets = [0, 0], sizes = [8, 128], strides = [1, 1]} : vector<8x512xf32> to vector<8x128xf32>
    %cst_111 = arith.constant 5.000000e-01 : f32
    %337 = vector.broadcast %cst_111 : f32 to vector<8x128xf32>
    %338 = arith.mulf %337, %336 : vector<8x128xf32>
    %339 = math.tanh %338 : vector<8x128xf32>
    %cst_112 = arith.constant 1.000000e+00 : f32
    %340 = vector.broadcast %cst_112 : f32 to vector<8x128xf32>
    %341 = arith.addf %339, %340 : vector<8x128xf32>
    %cst_113 = arith.constant 5.000000e-01 : f32
    %342 = vector.broadcast %cst_113 : f32 to vector<8x128xf32>
    %343 = arith.mulf %342, %341 : vector<8x128xf32>
    %344 = vector.extract_strided_slice %335 {offsets = [0, 128], sizes = [8, 128], strides = [1, 1]} : vector<8x512xf32> to vector<8x128xf32>
    %cst_114 = arith.constant 5.000000e-01 : f32
    %345 = vector.broadcast %cst_114 : f32 to vector<8x128xf32>
    %346 = arith.mulf %345, %344 : vector<8x128xf32>
    %347 = math.tanh %346 : vector<8x128xf32>
    %cst_115 = arith.constant 1.000000e+00 : f32
    %348 = vector.broadcast %cst_115 : f32 to vector<8x128xf32>
    %349 = arith.addf %347, %348 : vector<8x128xf32>
    %cst_116 = arith.constant 5.000000e-01 : f32
    %350 = vector.broadcast %cst_116 : f32 to vector<8x128xf32>
    %351 = arith.mulf %350, %349 : vector<8x128xf32>
    %352 = vector.extract_strided_slice %335 {offsets = [0, 256], sizes = [8, 128], strides = [1, 1]} : vector<8x512xf32> to vector<8x128xf32>
    %353 = math.tanh %352 : vector<8x128xf32>
    %354 = vector.extract_strided_slice %335 {offsets = [0, 384], sizes = [8, 128], strides = [1, 1]} : vector<8x512xf32> to vector<8x128xf32>
    %cst_117 = arith.constant 5.000000e-01 : f32
    %355 = vector.broadcast %cst_117 : f32 to vector<8x128xf32>
    %356 = arith.mulf %355, %354 : vector<8x128xf32>
    %357 = math.tanh %356 : vector<8x128xf32>
    %cst_118 = arith.constant 1.000000e+00 : f32
    %358 = vector.broadcast %cst_118 : f32 to vector<8x128xf32>
    %359 = arith.addf %357, %358 : vector<8x128xf32>
    %cst_119 = arith.constant 5.000000e-01 : f32
    %360 = vector.broadcast %cst_119 : f32 to vector<8x128xf32>
    %361 = arith.mulf %360, %359 : vector<8x128xf32>
    %362 = arith.mulf %351, %319 : vector<8x128xf32>
    %363 = arith.mulf %343, %353 : vector<8x128xf32>
    %364 = arith.addf %362, %363 : vector<8x128xf32>
    %365 = math.tanh %364 : vector<8x128xf32>
    %366 = arith.mulf %361, %365 : vector<8x128xf32>
    %367 = arith.index_cast %c7_i32 : i32 to index
    %c0_120 = arith.constant 0 : index
    %c0_121 = arith.constant 0 : index
    %368 = vector.load %arg9[%367, %c0_120, %c0_121] : memref<12x8x128xf32, #tpu.memory_space<vmem>>, vector<1x8x128xf32>
    %369 = vector.shape_cast %368 : vector<1x8x128xf32> to vector<8x128xf32>
    %370 = vector.shape_cast %366 : vector<8x128xf32> to vector<1x8x128xf32>
    tpu.vector_store %arg9[%367, %c0_120, %c0_121], %370 {strides = array<i32>} : memref<12x8x128xf32, #tpu.memory_space<vmem>>, vector<1x8x128xf32>,
    %c8_i32 = arith.constant 8 : i32
    %c0_i32_122 = arith.constant 0 : i32
    %371 = arith.truncf %366 : vector<8x128xf32> to vector<8x128xbf16>
    %cst_123 = arith.constant dense<0.000000e+00> : vector<8x512xf32>
    %372 = tpu.matmul %371, %8, %cst_123 {dimension_numbers = #tpu.dot_dimension_numbers<[1], [0], [0], [1], [0, 0, 1, 1], [], []>} : vector<8x128xbf16>, vector<128x512xbf16>, vector<8x512xf32> -> vector<8x512xf32>
    %373 = arith.addf %6, %372 : vector<8x512xf32>
    %374 = vector.extract_strided_slice %373 {offsets = [0, 0], sizes = [8, 128], strides = [1, 1]} : vector<8x512xf32> to vector<8x128xf32>
    %cst_124 = arith.constant 5.000000e-01 : f32
    %375 = vector.broadcast %cst_124 : f32 to vector<8x128xf32>
    %376 = arith.mulf %375, %374 : vector<8x128xf32>
    %377 = math.tanh %376 : vector<8x128xf32>
    %cst_125 = arith.constant 1.000000e+00 : f32
    %378 = vector.broadcast %cst_125 : f32 to vector<8x128xf32>
    %379 = arith.addf %377, %378 : vector<8x128xf32>
    %cst_126 = arith.constant 5.000000e-01 : f32
    %380 = vector.broadcast %cst_126 : f32 to vector<8x128xf32>
    %381 = arith.mulf %380, %379 : vector<8x128xf32>
    %382 = vector.extract_strided_slice %373 {offsets = [0, 128], sizes = [8, 128], strides = [1, 1]} : vector<8x512xf32> to vector<8x128xf32>
    %cst_127 = arith.constant 5.000000e-01 : f32
    %383 = vector.broadcast %cst_127 : f32 to vector<8x128xf32>
    %384 = arith.mulf %383, %382 : vector<8x128xf32>
    %385 = math.tanh %384 : vector<8x128xf32>
    %cst_128 = arith.constant 1.000000e+00 : f32
    %386 = vector.broadcast %cst_128 : f32 to vector<8x128xf32>
    %387 = arith.addf %385, %386 : vector<8x128xf32>
    %cst_129 = arith.constant 5.000000e-01 : f32
    %388 = vector.broadcast %cst_129 : f32 to vector<8x128xf32>
    %389 = arith.mulf %388, %387 : vector<8x128xf32>
    %390 = vector.extract_strided_slice %373 {offsets = [0, 256], sizes = [8, 128], strides = [1, 1]} : vector<8x512xf32> to vector<8x128xf32>
    %391 = math.tanh %390 : vector<8x128xf32>
    %392 = vector.extract_strided_slice %373 {offsets = [0, 384], sizes = [8, 128], strides = [1, 1]} : vector<8x512xf32> to vector<8x128xf32>
    %cst_130 = arith.constant 5.000000e-01 : f32
    %393 = vector.broadcast %cst_130 : f32 to vector<8x128xf32>
    %394 = arith.mulf %393, %392 : vector<8x128xf32>
    %395 = math.tanh %394 : vector<8x128xf32>
    %cst_131 = arith.constant 1.000000e+00 : f32
    %396 = vector.broadcast %cst_131 : f32 to vector<8x128xf32>
    %397 = arith.addf %395, %396 : vector<8x128xf32>
    %cst_132 = arith.constant 5.000000e-01 : f32
    %398 = vector.broadcast %cst_132 : f32 to vector<8x128xf32>
    %399 = arith.mulf %398, %397 : vector<8x128xf32>
    %400 = arith.mulf %389, %364 : vector<8x128xf32>
    %401 = arith.mulf %381, %391 : vector<8x128xf32>
    %402 = arith.addf %400, %401 : vector<8x128xf32>
    %403 = math.tanh %402 : vector<8x128xf32>
    %404 = arith.mulf %399, %403 : vector<8x128xf32>
    %c8_i32_133 = arith.constant 8 : i32
    %405 = arith.addi %c8_i32_133, %c0_i32_122 : i32
    %406 = arith.index_cast %405 : i32 to index
    %c0_134 = arith.constant 0 : index
    %c0_135 = arith.constant 0 : index
    %407 = vector.load %arg9[%406, %c0_134, %c0_135] : memref<12x8x128xf32, #tpu.memory_space<vmem>>, vector<1x8x128xf32>
    %408 = vector.shape_cast %407 : vector<1x8x128xf32> to vector<8x128xf32>
    %409 = vector.shape_cast %404 : vector<8x128xf32> to vector<1x8x128xf32>
    tpu.vector_store %arg9[%406, %c0_134, %c0_135], %409 {strides = array<i32>} : memref<12x8x128xf32, #tpu.memory_space<vmem>>, vector<1x8x128xf32>,
    %c1_i32_136 = arith.constant 1 : i32
    %410 = arith.truncf %404 : vector<8x128xf32> to vector<8x128xbf16>
    %cst_137 = arith.constant dense<0.000000e+00> : vector<8x512xf32>
    %411 = tpu.matmul %410, %8, %cst_137 {dimension_numbers = #tpu.dot_dimension_numbers<[1], [0], [0], [1], [0, 0, 1, 1], [], []>} : vector<8x128xbf16>, vector<128x512xbf16>, vector<8x512xf32> -> vector<8x512xf32>
    %412 = arith.addf %6, %411 : vector<8x512xf32>
    %413 = vector.extract_strided_slice %412 {offsets = [0, 0], sizes = [8, 128], strides = [1, 1]} : vector<8x512xf32> to vector<8x128xf32>
    %cst_138 = arith.constant 5.000000e-01 : f32
    %414 = vector.broadcast %cst_138 : f32 to vector<8x128xf32>
    %415 = arith.mulf %414, %413 : vector<8x128xf32>
    %416 = math.tanh %415 : vector<8x128xf32>
    %cst_139 = arith.constant 1.000000e+00 : f32
    %417 = vector.broadcast %cst_139 : f32 to vector<8x128xf32>
    %418 = arith.addf %416, %417 : vector<8x128xf32>
    %cst_140 = arith.constant 5.000000e-01 : f32
    %419 = vector.broadcast %cst_140 : f32 to vector<8x128xf32>
    %420 = arith.mulf %419, %418 : vector<8x128xf32>
    %421 = vector.extract_strided_slice %412 {offsets = [0, 128], sizes = [8, 128], strides = [1, 1]} : vector<8x512xf32> to vector<8x128xf32>
    %cst_141 = arith.constant 5.000000e-01 : f32
    %422 = vector.broadcast %cst_141 : f32 to vector<8x128xf32>
    %423 = arith.mulf %422, %421 : vector<8x128xf32>
    %424 = math.tanh %423 : vector<8x128xf32>
    %cst_142 = arith.constant 1.000000e+00 : f32
    %425 = vector.broadcast %cst_142 : f32 to vector<8x128xf32>
    %426 = arith.addf %424, %425 : vector<8x128xf32>
    %cst_143 = arith.constant 5.000000e-01 : f32
    %427 = vector.broadcast %cst_143 : f32 to vector<8x128xf32>
    %428 = arith.mulf %427, %426 : vector<8x128xf32>
    %429 = vector.extract_strided_slice %412 {offsets = [0, 256], sizes = [8, 128], strides = [1, 1]} : vector<8x512xf32> to vector<8x128xf32>
    %430 = math.tanh %429 : vector<8x128xf32>
    %431 = vector.extract_strided_slice %412 {offsets = [0, 384], sizes = [8, 128], strides = [1, 1]} : vector<8x512xf32> to vector<8x128xf32>
    %cst_144 = arith.constant 5.000000e-01 : f32
    %432 = vector.broadcast %cst_144 : f32 to vector<8x128xf32>
    %433 = arith.mulf %432, %431 : vector<8x128xf32>
    %434 = math.tanh %433 : vector<8x128xf32>
    %cst_145 = arith.constant 1.000000e+00 : f32
    %435 = vector.broadcast %cst_145 : f32 to vector<8x128xf32>
    %436 = arith.addf %434, %435 : vector<8x128xf32>
    %cst_146 = arith.constant 5.000000e-01 : f32
    %437 = vector.broadcast %cst_146 : f32 to vector<8x128xf32>
    %438 = arith.mulf %437, %436 : vector<8x128xf32>
    %439 = arith.mulf %428, %402 : vector<8x128xf32>
    %440 = arith.mulf %420, %430 : vector<8x128xf32>
    %441 = arith.addf %439, %440 : vector<8x128xf32>
    %442 = math.tanh %441 : vector<8x128xf32>
    %443 = arith.mulf %438, %442 : vector<8x128xf32>
    %c8_i32_147 = arith.constant 8 : i32
    %444 = arith.addi %c8_i32_147, %c1_i32_136 : i32
    %445 = arith.index_cast %444 : i32 to index
    %c0_148 = arith.constant 0 : index
    %c0_149 = arith.constant 0 : index
    %446 = vector.load %arg9[%445, %c0_148, %c0_149] : memref<12x8x128xf32, #tpu.memory_space<vmem>>, vector<1x8x128xf32>
    %447 = vector.shape_cast %446 : vector<1x8x128xf32> to vector<8x128xf32>
    %448 = vector.shape_cast %443 : vector<8x128xf32> to vector<1x8x128xf32>
    tpu.vector_store %arg9[%445, %c0_148, %c0_149], %448 {strides = array<i32>} : memref<12x8x128xf32, #tpu.memory_space<vmem>>, vector<1x8x128xf32>,
    %c2_i32_150 = arith.constant 2 : i32
    %449 = arith.truncf %443 : vector<8x128xf32> to vector<8x128xbf16>
    %cst_151 = arith.constant dense<0.000000e+00> : vector<8x512xf32>
    %450 = tpu.matmul %449, %8, %cst_151 {dimension_numbers = #tpu.dot_dimension_numbers<[1], [0], [0], [1], [0, 0, 1, 1], [], []>} : vector<8x128xbf16>, vector<128x512xbf16>, vector<8x512xf32> -> vector<8x512xf32>
    %451 = arith.addf %6, %450 : vector<8x512xf32>
    %452 = vector.extract_strided_slice %451 {offsets = [0, 0], sizes = [8, 128], strides = [1, 1]} : vector<8x512xf32> to vector<8x128xf32>
    %cst_152 = arith.constant 5.000000e-01 : f32
    %453 = vector.broadcast %cst_152 : f32 to vector<8x128xf32>
    %454 = arith.mulf %453, %452 : vector<8x128xf32>
    %455 = math.tanh %454 : vector<8x128xf32>
    %cst_153 = arith.constant 1.000000e+00 : f32
    %456 = vector.broadcast %cst_153 : f32 to vector<8x128xf32>
    %457 = arith.addf %455, %456 : vector<8x128xf32>
    %cst_154 = arith.constant 5.000000e-01 : f32
    %458 = vector.broadcast %cst_154 : f32 to vector<8x128xf32>
    %459 = arith.mulf %458, %457 : vector<8x128xf32>
    %460 = vector.extract_strided_slice %451 {offsets = [0, 128], sizes = [8, 128], strides = [1, 1]} : vector<8x512xf32> to vector<8x128xf32>
    %cst_155 = arith.constant 5.000000e-01 : f32
    %461 = vector.broadcast %cst_155 : f32 to vector<8x128xf32>
    %462 = arith.mulf %461, %460 : vector<8x128xf32>
    %463 = math.tanh %462 : vector<8x128xf32>
    %cst_156 = arith.constant 1.000000e+00 : f32
    %464 = vector.broadcast %cst_156 : f32 to vector<8x128xf32>
    %465 = arith.addf %463, %464 : vector<8x128xf32>
    %cst_157 = arith.constant 5.000000e-01 : f32
    %466 = vector.broadcast %cst_157 : f32 to vector<8x128xf32>
    %467 = arith.mulf %466, %465 : vector<8x128xf32>
    %468 = vector.extract_strided_slice %451 {offsets = [0, 256], sizes = [8, 128], strides = [1, 1]} : vector<8x512xf32> to vector<8x128xf32>
    %469 = math.tanh %468 : vector<8x128xf32>
    %470 = vector.extract_strided_slice %451 {offsets = [0, 384], sizes = [8, 128], strides = [1, 1]} : vector<8x512xf32> to vector<8x128xf32>
    %cst_158 = arith.constant 5.000000e-01 : f32
    %471 = vector.broadcast %cst_158 : f32 to vector<8x128xf32>
    %472 = arith.mulf %471, %470 : vector<8x128xf32>
    %473 = math.tanh %472 : vector<8x128xf32>
    %cst_159 = arith.constant 1.000000e+00 : f32
    %474 = vector.broadcast %cst_159 : f32 to vector<8x128xf32>
    %475 = arith.addf %473, %474 : vector<8x128xf32>
    %cst_160 = arith.constant 5.000000e-01 : f32
    %476 = vector.broadcast %cst_160 : f32 to vector<8x128xf32>
    %477 = arith.mulf %476, %475 : vector<8x128xf32>
    %478 = arith.mulf %467, %441 : vector<8x128xf32>
    %479 = arith.mulf %459, %469 : vector<8x128xf32>
    %480 = arith.addf %478, %479 : vector<8x128xf32>
    %481 = math.tanh %480 : vector<8x128xf32>
    %482 = arith.mulf %477, %481 : vector<8x128xf32>
    %c8_i32_161 = arith.constant 8 : i32
    %483 = arith.addi %c8_i32_161, %c2_i32_150 : i32
    %484 = arith.index_cast %483 : i32 to index
    %c0_162 = arith.constant 0 : index
    %c0_163 = arith.constant 0 : index
    %485 = vector.load %arg9[%484, %c0_162, %c0_163] : memref<12x8x128xf32, #tpu.memory_space<vmem>>, vector<1x8x128xf32>
    %486 = vector.shape_cast %485 : vector<1x8x128xf32> to vector<8x128xf32>
    %487 = vector.shape_cast %482 : vector<8x128xf32> to vector<1x8x128xf32>
    tpu.vector_store %arg9[%484, %c0_162, %c0_163], %487 {strides = array<i32>} : memref<12x8x128xf32, #tpu.memory_space<vmem>>, vector<1x8x128xf32>,
    %c3_i32_164 = arith.constant 3 : i32
    %488 = arith.truncf %482 : vector<8x128xf32> to vector<8x128xbf16>
    %cst_165 = arith.constant dense<0.000000e+00> : vector<8x512xf32>
    %489 = tpu.matmul %488, %8, %cst_165 {dimension_numbers = #tpu.dot_dimension_numbers<[1], [0], [0], [1], [0, 0, 1, 1], [], []>} : vector<8x128xbf16>, vector<128x512xbf16>, vector<8x512xf32> -> vector<8x512xf32>
    %490 = arith.addf %6, %489 : vector<8x512xf32>
    %491 = vector.extract_strided_slice %490 {offsets = [0, 0], sizes = [8, 128], strides = [1, 1]} : vector<8x512xf32> to vector<8x128xf32>
    %cst_166 = arith.constant 5.000000e-01 : f32
    %492 = vector.broadcast %cst_166 : f32 to vector<8x128xf32>
    %493 = arith.mulf %492, %491 : vector<8x128xf32>
    %494 = math.tanh %493 : vector<8x128xf32>
    %cst_167 = arith.constant 1.000000e+00 : f32
    %495 = vector.broadcast %cst_167 : f32 to vector<8x128xf32>
    %496 = arith.addf %494, %495 : vector<8x128xf32>
    %cst_168 = arith.constant 5.000000e-01 : f32
    %497 = vector.broadcast %cst_168 : f32 to vector<8x128xf32>
    %498 = arith.mulf %497, %496 : vector<8x128xf32>
    %499 = vector.extract_strided_slice %490 {offsets = [0, 128], sizes = [8, 128], strides = [1, 1]} : vector<8x512xf32> to vector<8x128xf32>
    %cst_169 = arith.constant 5.000000e-01 : f32
    %500 = vector.broadcast %cst_169 : f32 to vector<8x128xf32>
    %501 = arith.mulf %500, %499 : vector<8x128xf32>
    %502 = math.tanh %501 : vector<8x128xf32>
    %cst_170 = arith.constant 1.000000e+00 : f32
    %503 = vector.broadcast %cst_170 : f32 to vector<8x128xf32>
    %504 = arith.addf %502, %503 : vector<8x128xf32>
    %cst_171 = arith.constant 5.000000e-01 : f32
    %505 = vector.broadcast %cst_171 : f32 to vector<8x128xf32>
    %506 = arith.mulf %505, %504 : vector<8x128xf32>
    %507 = vector.extract_strided_slice %490 {offsets = [0, 256], sizes = [8, 128], strides = [1, 1]} : vector<8x512xf32> to vector<8x128xf32>
    %508 = math.tanh %507 : vector<8x128xf32>
    %509 = vector.extract_strided_slice %490 {offsets = [0, 384], sizes = [8, 128], strides = [1, 1]} : vector<8x512xf32> to vector<8x128xf32>
    %cst_172 = arith.constant 5.000000e-01 : f32
    %510 = vector.broadcast %cst_172 : f32 to vector<8x128xf32>
    %511 = arith.mulf %510, %509 : vector<8x128xf32>
    %512 = math.tanh %511 : vector<8x128xf32>
    %cst_173 = arith.constant 1.000000e+00 : f32
    %513 = vector.broadcast %cst_173 : f32 to vector<8x128xf32>
    %514 = arith.addf %512, %513 : vector<8x128xf32>
    %cst_174 = arith.constant 5.000000e-01 : f32
    %515 = vector.broadcast %cst_174 : f32 to vector<8x128xf32>
    %516 = arith.mulf %515, %514 : vector<8x128xf32>
    %517 = arith.mulf %506, %480 : vector<8x128xf32>
    %518 = arith.mulf %498, %508 : vector<8x128xf32>
    %519 = arith.addf %517, %518 : vector<8x128xf32>
    %520 = math.tanh %519 : vector<8x128xf32>
    %521 = arith.mulf %516, %520 : vector<8x128xf32>
    %c8_i32_175 = arith.constant 8 : i32
    %522 = arith.addi %c8_i32_175, %c3_i32_164 : i32
    %523 = arith.index_cast %522 : i32 to index
    %c0_176 = arith.constant 0 : index
    %c0_177 = arith.constant 0 : index
    %524 = vector.load %arg9[%523, %c0_176, %c0_177] : memref<12x8x128xf32, #tpu.memory_space<vmem>>, vector<1x8x128xf32>
    %525 = vector.shape_cast %524 : vector<1x8x128xf32> to vector<8x128xf32>
    %526 = vector.shape_cast %521 : vector<8x128xf32> to vector<1x8x128xf32>
    tpu.vector_store %arg9[%523, %c0_176, %c0_177], %526 {strides = array<i32>} : memref<12x8x128xf32, #tpu.memory_space<vmem>>, vector<1x8x128xf32>,
    %c4_i32_178 = arith.constant 4 : i32
    %c0_179 = arith.constant 0 : index
    %c0_180 = arith.constant 0 : index
    %c0_181 = arith.constant 0 : index
    %527 = vector.load %arg9[%c0_179, %c0_180, %c0_181] : memref<12x8x128xf32, #tpu.memory_space<vmem>>, vector<12x8x128xf32>
    %528 = vector.shape_cast %527 : vector<12x8x128xf32> to vector<96x128xf32>
    %c0_182 = arith.constant 0 : index
    %c0_183 = arith.constant 0 : index
    %529 = vector.load %arg6[%c0_182, %c0_183] : memref<128x128xf32, #tpu.memory_space<vmem>>, vector<128x128xf32>
    %cst_184 = arith.constant dense<0.000000e+00> : vector<96x128xf32>
    %530 = tpu.matmul %528, %529, %cst_184 {dimension_numbers = #tpu.dot_dimension_numbers<[1], [0], [0], [1], [0, 0, 1, 1], [], []>} : vector<96x128xf32>, vector<128x128xf32>, vector<96x128xf32> -> vector<96x128xf32>
    %c0_185 = arith.constant 0 : index
    %c0_186 = arith.constant 0 : index
    %531 = vector.load %arg7[%c0_185, %c0_186] : memref<1x1xf32, #tpu.memory_space<vmem>>, vector<1x1xf32>
    %532 = vector.broadcast %531 : vector<1x1xf32> to vector<96x128xf32>
    %533 = arith.addf %530, %532 : vector<96x128xf32>
    %c0_187 = arith.constant 0 : index
    %c0_188 = arith.constant 0 : index
    %534 = vector.load %arg8[%c0_187, %c0_188] : memref<96x128xf32, #tpu.memory_space<vmem>>, vector<96x128xf32>
    tpu.vector_store %arg8[%c0_187, %c0_188], %533 {strides = array<i32>} : memref<96x128xf32, #tpu.memory_space<vmem>>, vector<96x128xf32>,
    return
  }
}

</mosaic_0001>

<bundles_post_ra>
// kernel: squeeze.1
= control target key start
LH: loop header
LB: loop body
LE: loop exit
PB: predicated region body
PF: predicated region fallthrough
CT: control target
= control target key end

     0   :  { %s98_s8 = smov 104   ;;  %vm7_vm0 = vcmask 64512   ;;  %s99_s11 = smov 112   ;;  %s169_s0 = inlined_call_operand.vmem [shape: f32[96], index: 0, kind: input, shape index: {}]   ;;  %s170_s1 = inlined_call_operand.vmem [shape: f32[12,8], index: 1, kind: output, shape index: {}]  }
   0x1   :  { %v4_v0 = vld [vmem:[%s169_s0] sm:$0x1]  ;;  %s97_s0 = smov 120   ;;  %s100_s12 = smov 96  }
   0x2   :  { %5 = vst [vmem:[#allocation0] sm:$0x1] %v4_v0  ;;  %s101_s13 = smov 88   ;;  %s102_s14 = smov 80  }
   0x3   :  { %s103_s15 = smov 72   ;;  %s104_s16 = smov 64  }
   0x4   :  { %s105_s17 = smov 56   ;;  %s106_s18 = smov 48  }
   0x5   :  { %s107_s19 = smov 40  }
   0x9   :  { %v9_v1 = vld [vmem:[#allocation0] sm:$0x1]  }
   0xa   :  { %v21_v2 = vld [vmem:[#allocation0] sm:$0x1]   ;;  %10 = vrot.lane.b32.xlu0 %v9_v1, %s97_s0 }
   0xb   :  { %22 = vrot.lane.b32.xlu1 %v21_v2, %s98_s8  ;;  %v15_v3 = vld [vmem:[#allocation0] sm:$0x1]  }
   0xc   :  { %v27_v4 = vld [vmem:[#allocation0] sm:$0x1]  }
   0xd   :  { %v6_v5 = vld [vmem:[#allocation0] sm:$0x1]  }
   0xe   :  { %8 = vst.msk [vmem:[%s170_s1] sm:$0x1] %vm7_vm0, %v6_v5   ;;  %16 = vrot.lane.b32.xlu0 %v15_v3, %s99_s11  ;;  %v33_v6 = vld [vmem:[#allocation0] sm:$0x1]  }
   0xf   :  { %28 = vrot.lane.b32.xlu1 %v27_v4, %s100_s12  ;;  %v39_v7 = vld [vmem:[#allocation0] sm:$0x1]  }
  0x10   :  { %v45_v8 = vld [vmem:[#allocation0] sm:$0x1]  }
  0x11   :  { %v51_v9 = vld [vmem:[#allocation0] sm:$0x1]  }
  0x12   :  { %34 = vrot.lane.b32.xlu0 %v33_v6, %s101_s13  ;;  %v57_v10 = vld [vmem:[#allocation0] sm:$0x1]  }
  0x13   :  { %40 = vrot.lane.b32.xlu1 %v39_v7, %s102_s14  ;;  %v63_v11 = vld [vmem:[#allocation0] sm:$0x1]  }
  0x14   :  { %v69_v12 = vld [vmem:[#allocation0] sm:$0x1]  }
  0x16   :  { %46 = vrot.lane.b32.xlu0 %v45_v8, %s103_s15 }
  0x17   :  { %52 = vrot.lane.b32.xlu1 %v51_v9, %s104_s16 }
  0x1a   :  { %58 = vrot.lane.b32.xlu0 %v57_v10, %s105_s17 }
  0x1b   :  { %64 = vrot.lane.b32.xlu1 %v63_v11, %s106_s18 }
  0x1e   :  { %70 = vrot.lane.b32.xlu0 %v69_v12, %s107_s19 }
  0x7c   :  { %v11_v13 = vpop.permute.xlu0 %10  }
  0x7d   :  { %v23_v14 = vpop.permute.xlu1 %22   ;;  %75 = vst.msk [vmem:[%s170_s1 + $0x1] sm:$0x1] %vm7_vm0, %v11_v13  }
  0x7e   :  { %77 = vst.msk [vmem:[%s170_s1 + $0x3] sm:$0x1] %vm7_vm0, %v23_v14  }
  0x80   :  { %v17_v15 = vpop.permute.xlu0 %16  }
  0x81   :  { %v29_v16 = vpop.permute.xlu1 %28   ;;  %76 = vst.msk [vmem:[%s170_s1 + $0x2] sm:$0x1] %vm7_vm0, %v17_v15  }
  0x82   :  { %78 = vst.msk [vmem:[%s170_s1 + $0x4] sm:$0x1] %vm7_vm0, %v29_v16  }
  0x84   :  { %v35_v17 = vpop.permute.xlu0 %34  }
  0x85   :  { %v41_v18 = vpop.permute.xlu1 %40   ;;  %79 = vst.msk [vmem:[%s170_s1 + $0x5] sm:$0x1] %vm7_vm0, %v35_v17  }
  0x86   :  { %80 = vst.msk [vmem:[%s170_s1 + $0x6] sm:$0x1] %vm7_vm0, %v41_v18  }
  0x88   :  { %v47_v19 = vpop.permute.xlu0 %46  }
  0x89   :  { %v53_v20 = vpop.permute.xlu1 %52   ;;  %81 = vst.msk [vmem:[%s170_s1 + $0x7] sm:$0x1] %vm7_vm0, %v47_v19  }
  0x8a   :  { %82 = vst.msk [vmem:[%s170_s1 + $0x8] sm:$0x1] %vm7_vm0, %v53_v20  }
  0x8c   :  { %v59_v21 = vpop.permute.xlu0 %58  }
  0x8d   :  { %v65_v22 = vpop.permute.xlu1 %64   ;;  %83 = vst.msk [vmem:[%s170_s1 + $0x9] sm:$0x1] %vm7_vm0, %v59_v21  }
  0x8e   :  { %84 = vst.msk [vmem:[%s170_s1 + $0xa] sm:$0x1] %vm7_vm0, %v65_v22  }
  0x90   :  { %v71_v23 = vpop.permute.xlu0 %70  }
  0x91   :  { %85 = vst.msk [vmem:[%s170_s1 + $0xb] sm:$0x1] %vm7_vm0, %v71_v23  }

// kernel: sinlstm_forward.1
= control target key start
LH: loop header
LB: loop body
LE: loop exit
PB: predicated region body
PF: predicated region fallthrough
CT: control target
= control target key end

     0   :  { %v3708_v1 = vmov 0   ;;  %v35_v39 = vlaneseq  ;;  %s3699_s2 = inlined_call_operand.vmem [shape: bf16[128,512], index: 2, kind: input, shape index: {}]   ;;  %s3700_s7 = inlined_call_operand.<no memory space> [shape: f32[1,1], index: 7, kind: input, shape index: {}]   ;;  %s3701_s0 = inlined_call_operand.vmem [shape: f32[8,8,1], index: 0, kind: input, shape index: {}]   ;;  %s3702_s1 = inlined_call_operand.vmem [shape: f32[1,512], index: 1, kind: input, shape index: {}]   ;;  %s3703_s3 = inlined_call_operand.vmem [shape: f32[1,512], index: 3, kind: input, shape index: {}]   ;;  %s3704_s4 = inlined_call_operand.vmem [shape: bf16[128,512], index: 4, kind: input, shape index: {}]   ;;  %s3705_s5 = inlined_call_operand.vmem [shape: f32[1,512], index: 5, kind: input, shape index: {}]   ;;  %s3706_s6 = inlined_call_operand.vmem [shape: f32[128,128], index: 6, kind: input, shape index: {}]   ;;  %s3707_s8 = inlined_call_operand.vmem [shape: f32[96,128], index: 8, kind: output, shape index: {}]  }
   0x1   :  { %v2543_v0 = vld [vmem:[%s3699_s2 + $0x4] ss:$16 sps:$4 sm:$0xff]   ;;  %368 = vmatprep.mubr.bf16.mxu1 %v3708_v1  ;;  %2245 = vset.pattern.permute.xlu0 %v3708_v1  ;;  %v13_v2 = vstv %s3700_s7  ;;  %v2553_v3 = vld [vmem:[%s3699_s2] ss:$16 sps:$4 sm:$0xff]   ;;  %v2094_v17 = vld [vmem:[%s3701_s0 + $0x8] sm:$0xff] }
   0x2   :  { %14 = vst [vmem:[#allocation3] sm:$0x1] %v13_v2  ;;  %489 = vmatprep.mubr.bf16.mxu0 %v3708_v1  ;;  %2246 = vset.pattern.permute.xlu1 %v3708_v1  ;;  %v2561_v4 = vld [vmem:[%s3699_s2 + $0x24] ss:$16 sps:$4 sm:$0xff]   ;;  %v2568_v5 = vld [vmem:[%s3699_s2 + $0x20] ss:$16 sps:$4 sm:$0xff]  }
   0x3   :  { %336 = vmatprep.subr.bf16.mxu1 %v2543_v0  ;;  %457 = vmatprep.subr.bf16.mxu0 %v2543_v0  ;;  %v2575_v6 = vld [vmem:[%s3699_s2 + $0x44] ss:$16 sps:$4 sm:$0xff]   ;;  %v2582_v7 = vld [vmem:[%s3699_s2 + $0x40] ss:$16 sps:$4 sm:$0xff]   ;;  %v2668_v21 = vld [vmem:[%s3699_s2 + $0xc] ss:$16 sps:$4 sm:$0xff]  }
   0x4   :  { %337 = vmatpush1.bf16.msra.mxu1 %v2553_v3  ;;  %458 = vmatpush1.bf16.msra.mxu0 %v2553_v3  ;;  %v2589_v8 = vld [vmem:[%s3699_s2 + $0x64] ss:$16 sps:$4 sm:$0xff]   ;;  %v2596_v9 = vld [vmem:[%s3699_s2 + $0x60] ss:$16 sps:$4 sm:$0xff]   ;;  %v2675_v22 = vld [vmem:[%s3699_s2 + $0x8] ss:$16 sps:$4 sm:$0xff]  }
   0x5   :  { %338 = vmatprep.subr.bf16.mxu1 %v2561_v4  ;;  %459 = vmatprep.subr.bf16.mxu0 %v2561_v4  ;;  %v2603_v10 = vld [vmem:[%s3699_s2 + $0x84] ss:$16 sps:$4 sm:$0xff]   ;;  %v2610_v11 = vld [vmem:[%s3699_s2 + $0x80] ss:$16 sps:$4 sm:$0xff]   ;;  %v2685_v24 = vld [vmem:[%s3699_s2 + $0x2c] ss:$16 sps:$4 sm:$0xff]  }
   0x6   :  { %v2617_v12 = vld [vmem:[%s3699_s2 + $0xa4] ss:$16 sps:$4 sm:$0xff]   ;;  %v2624_v13 = vld [vmem:[%s3699_s2 + $0xa0] ss:$16 sps:$4 sm:$0xff]   ;;  %v2693_v25 = vld [vmem:[%s3699_s2 + $0x28] ss:$16 sps:$4 sm:$0xff]  }
   0x7   :  { %v2631_v14 = vld [vmem:[%s3699_s2 + $0xc4] ss:$16 sps:$4 sm:$0xff]   ;;  %v2641_v16 = vld [vmem:[%s3699_s2 + $0xc0] ss:$16 sps:$4 sm:$0xff]   ;;  %v2700_v27 = vld [vmem:[%s3699_s2 + $0x4c] ss:$16 sps:$4 sm:$0xff]  }
   0x8   :  { %339 = vmatpush1.bf16.msra.mxu1 %v2568_v5  ;;  %460 = vmatpush1.bf16.msra.mxu0 %v2568_v5  ;;  %v141_v15 = vld [vmem:[%s3701_s0] sm:$0xff]  ;;  %v2099_v23 = vld [vmem:[%s3701_s0 + $0x30] sm:$0xff]  ;;  %v2706_v28 = vld [vmem:[%s3699_s2 + $0x48] ss:$16 sps:$4 sm:$0xff]   ;;  %v36_v40 = vshrl.u32 %v35_v39, 7 }
   0x9   :  { %340 = vmatprep.subr.bf16.mxu1 %v2575_v6  ;;  %461 = vmatprep.subr.bf16.mxu0 %v2575_v6  ;;  %v2651_v18 = vld [vmem:[%s3699_s2 + $0xe4] ss:$16 sps:$4 sm:$0xff]   ;;  %v2658_v19 = vld [vmem:[%s3699_s2 + $0xe0] ss:$16 sps:$4 sm:$0xff]   ;;  %v2712_v29 = vld [vmem:[%s3699_s2 + $0x6c] ss:$16 sps:$4 sm:$0xff]  }
   0xa   :  { %144 = vperm.xlu0 %2245, %v141_v15   ;;  %v2097_v20 = vld [vmem:[%s3701_s0 + $0x20] sm:$0xff]  ;;  %v2718_v30 = vld [vmem:[%s3699_s2 + $0x68] ss:$16 sps:$4 sm:$0xff]   ;;  %v2724_v31 = vld [vmem:[%s3699_s2 + $0x8c] ss:$16 sps:$4 sm:$0xff]   ;;  %v2789_v42 = vsub.s32 1, %v36_v40 }
   0xb   :  { %v2133_v26 = vld [vmem:[#allocation3] ss:$0 sm:$0xff]  ;;  %v2730_v32 = vld [vmem:[%s3699_s2 + $0x88] ss:$16 sps:$4 sm:$0xff]   ;;  %v2736_v33 = vld [vmem:[%s3699_s2 + $0xac] ss:$16 sps:$4 sm:$0xff]  }
   0xc   :  { %341 = vmatpush1.bf16.msra.mxu1 %v2582_v7  ;;  %462 = vmatpush1.bf16.msra.mxu0 %v2582_v7  ;;  %v2742_v34 = vld [vmem:[%s3699_s2 + $0xa8] ss:$16 sps:$4 sm:$0xff]   ;;  %v2748_v35 = vld [vmem:[%s3699_s2 + $0xcc] ss:$16 sps:$4 sm:$0xff]   ;;  %3716 = vst [vmem:[#allocation4_spill] sm:$0xff] %v2789_v42  ;;  %v2794_v46 = vsub.s32 0, %v36_v40 }
   0xd   :  { %342 = vmatprep.subr.bf16.mxu1 %v2589_v8  ;;  %463 = vmatprep.subr.bf16.mxu0 %v2589_v8  ;;  %v2754_v36 = vld [vmem:[%s3699_s2 + $0xc8] ss:$16 sps:$4 sm:$0xff]   ;;  %v2760_v37 = vld [vmem:[%s3699_s2 + $0xec] ss:$16 sps:$4 sm:$0xff]   ;;  %v32_v44 = vld [vmem:[%s3702_s1] sm:$0xf] }
   0xe   :  { %445 = vperm.xlu0 %2245, %v2094_v17   ;;  %v2766_v38 = vld [vmem:[%s3699_s2 + $0xe8] ss:$16 sps:$4 sm:$0xff]   ;;  %3717 = vst [vmem:[#allocation5_spill] sm:$0xff] %v2794_v46  ;;  %v2797_v48 = vrot.slane %v32_v44, %v2789_v42  ;;  %v33_v50 = vld [vmem:[%s3703_s3] sm:$0xf]  ;;  %v2803_v51 = vrot.slane %v32_v44, %v2794_v46  ;;  %v2815_v60 = vsub.s32 2, %v36_v40 }
   0xf   :  { %v2806_v52 = vrot.slane %v33_v50, %v2789_v42  ;;  %v2810_v54 = vrot.slane %v33_v50, %v2794_v46  ;;  %v2817_v61 = vsub.s32 3, %v36_v40 }
  0x10   :  { %343 = vmatpush1.bf16.msra.mxu1 %v2596_v9  ;;  %464 = vmatpush1.bf16.msra.mxu0 %v2596_v9  ;;  %3718 = vst [vmem:[#allocation6_spill] sm:$0xff] %v2815_v60  ;;  %v2820_v2 = vrot.slane %v32_v44, %v2815_v60  ;;  %v2826_v17 = vrot.slane %v33_v50, %v2815_v60 }
  0x11   :  { %344 = vmatprep.subr.bf16.mxu1 %v2603_v10  ;;  %465 = vmatprep.subr.bf16.mxu0 %v2603_v10  ;;  %3719 = vst [vmem:[#allocation7_spill] sm:$0xff] %v2817_v61  ;;  %v2823_v15 = vrot.slane %v32_v44, %v2817_v61 }
  0x12   :  { %811 = vperm.xlu0 %2245, %v2097_v20  }
  0x14   :  { %345 = vmatpush1.bf16.msra.mxu1 %v2610_v11  ;;  %466 = vmatpush1.bf16.msra.mxu0 %v2610_v11 }
  0x15   :  { %346 = vmatprep.subr.bf16.mxu1 %v2617_v12  ;;  %467 = vmatprep.subr.bf16.mxu0 %v2617_v12 }
  0x16   :  { %1055 = vperm.xlu0 %2245, %v2099_v23   ;;  %v2830_v23 = vrot.slane %v33_v50, %v2817_v61 }
  0x18   :  { %347 = vmatpush1.bf16.msra.mxu1 %v2624_v13  ;;  %468 = vmatpush1.bf16.msra.mxu0 %v2624_v13 }
  0x19   :  { %348 = vmatprep.subr.bf16.mxu1 %v2631_v14  ;;  %469 = vmatprep.subr.bf16.mxu0 %v2631_v14 }
  0x1a   :  { %1918 = vperm.xlu0 %2245, %v2133_v26  }
  0x1c   :  { %349 = vmatpush1.bf16.msra.mxu1 %v2641_v16  ;;  %470 = vmatpush1.bf16.msra.mxu0 %v2641_v16 }
  0x1d   :  { %350 = vmatprep.subr.bf16.mxu1 %v2651_v18  ;;  %471 = vmatprep.subr.bf16.mxu0 %v2651_v18 }
  0x20   :  { %351 = vmatpush1.bf16.msra.mxu1 %v2658_v19  ;;  %472 = vmatpush1.bf16.msra.mxu0 %v2658_v19 }
  0x21   :  { %377 = vmatprep.subr.bf16.mxu1 %v2668_v21  ;;  %579 = vmatprep.subr.bf16.mxu0 %v2543_v0 }
  0x23   :  { %369 = vmatmul.mubr.bf16.vlgmr.msra.gmra.mrb[0].mxu1 %v3708_v1 }
  0x24   :  { %378 = vmatpush1.bf16.msra.mxu1 %v2675_v22  ;;  %409 = vmatprep.mubr.bf16.mxu1 %v3708_v1 }
  0x25   :  { %379 = vmatprep.subr.bf16.mxu1 %v2685_v24 }
  0x28   :  { %380 = vmatpush1.bf16.msra.mxu1 %v2693_v25 }
  0x29   :  { %381 = vmatprep.subr.bf16.mxu1 %v2700_v27 }
  0x2c   :  { %382 = vmatpush1.bf16.msra.mxu1 %v2706_v28 }
  0x2d   :  { %383 = vmatprep.subr.bf16.mxu1 %v2712_v29 }
  0x30   :  { %384 = vmatpush1.bf16.msra.mxu1 %v2718_v30 }
  0x31   :  { %385 = vmatprep.subr.bf16.mxu1 %v2724_v31 }
  0x34   :  { %386 = vmatpush1.bf16.msra.mxu1 %v2730_v32 }
  0x35   :  { %387 = vmatprep.subr.bf16.mxu1 %v2736_v33 }
  0x38   :  { %388 = vmatpush1.bf16.msra.mxu1 %v2742_v34 }
  0x39   :  { %389 = vmatprep.subr.bf16.mxu1 %v2748_v35 }
  0x3c   :  { %390 = vmatpush1.bf16.msra.mxu1 %v2754_v36 }
  0x3d   :  { %391 = vmatprep.subr.bf16.mxu1 %v2760_v37 }
  0x40   :  { %392 = vmatpush1.bf16.msra.mxu1 %v2766_v38 }
  0x41   :  { %498 = vmatprep.subr.bf16.mxu1 %v2668_v21 }
  0x43   :  { %410 = vmatmul.mubr.bf16.vlgmr.msra.gmra.mrb[4].mxu1 %v3708_v1 }
  0x44   :  { %499 = vmatpush1.bf16.msra.mxu1 %v2675_v22  ;;  %530 = vmatprep.mubr.bf16.mxu1 %v3708_v1 }
  0x45   :  { %500 = vmatprep.subr.bf16.mxu1 %v2685_v24 }
  0x48   :  { %501 = vmatpush1.bf16.msra.mxu1 %v2693_v25 }
  0x49   :  { %502 = vmatprep.subr.bf16.mxu1 %v2700_v27 }
  0x4c   :  { %503 = vmatpush1.bf16.msra.mxu1 %v2706_v28 }
  0x4d   :  { %504 = vmatprep.subr.bf16.mxu1 %v2712_v29 }
  0x50   :  { %505 = vmatpush1.bf16.msra.mxu1 %v2718_v30 }
  0x51   :  { %506 = vmatprep.subr.bf16.mxu1 %v2724_v31 }
  0x54   :  { %507 = vmatpush1.bf16.msra.mxu1 %v2730_v32 }
  0x55   :  { %508 = vmatprep.subr.bf16.mxu1 %v2736_v33 }
  0x58   :  { %509 = vmatpush1.bf16.msra.mxu1 %v2742_v34 }
  0x59   :  { %510 = vmatprep.subr.bf16.mxu1 %v2748_v35 }
  0x5c   :  { %511 = vmatpush1.bf16.msra.mxu1 %v2754_v36 }
  0x5d   :  { %512 = vmatprep.subr.bf16.mxu1 %v2760_v37 }
  0x60   :  { %513 = vmatpush1.bf16.msra.mxu1 %v2766_v38 }
  0x61   :  { %620 = vmatprep.subr.bf16.mxu1 %v2668_v21 }
  0x89   :  { %v145_v49 = vpop.permute.xlu0 %144 }
  0x8a   :  { %v169_v53 = vmul.f32 %v2797_v48, %v145_v49  ;;  %v168_v55 = vmul.f32 %v2803_v51, %v145_v49  ;;  %v170_v20 = vmul.f32 %v2820_v2, %v145_v49  ;;  %v171_v26 = vmul.f32 %v2823_v15, %v145_v49 }
  0x8c   :  { %v173_v56 = vadd.f32 %v169_v53, %v2806_v52  ;;  %v172_v57 = vadd.f32 %v168_v55, %v2810_v54  ;;  %v174_v39 = vadd.f32 %v170_v20, %v2826_v17 }
  0xf6   :  { %v370_v41 = vpop.f32.mrb[0].mxu1 }
  0xf7   :  { %v372_v43 = vpop.f32.mrb[1].mxu1  ;;  %v418_v59 = vadd.f32 %v370_v41, %v172_v57  ;;  %v175_v41 = vadd.f32 %v171_v26, %v2830_v23 }
  0xf8   :  { %v374_v45 = vpop.f32.mrb[2].mxu1  ;;  %v419_v58 = vadd.f32 %v372_v43, %v173_v56 }
  0xf9   :  { %v375_v47 = vpop.f32.mrb[3].mxu1  ;;  %v422_v63 = vmul.f32 0.5, %v418_v59 }
  0xfa   :  { %v426_v62 = vmul.f32 0.5, %v419_v58 }
  0xfc   :  { %2343 = vtanh.f32 %v426_v62 }
  0xfd   :  { %2345 = vtanh.f32 %v422_v63 }
 0x106   :  { %v2344_v53 = vpop.eup %2343 }
 0x107   :  { %v2346_v56 = vpop.eup %2345  ;;  %v428_v57 = vadd.f32 1.0, %v2344_v53  ;;  %v2096_v53 = vld [vmem:[%s3701_s0 + $0x18] sm:$0xff] }
 0x108   :  { %v424_v59 = vadd.f32 1.0, %v2346_v56  ;;  %v2100_v56 = vld [vmem:[%s3701_s0 + $0x38] sm:$0xff] }
 0x109   :  { %v429_v50 = vmul.f32 0.5, %v428_v57  ;;  %v446_v57 = vpop.permute.xlu0 %445 }
 0x10a   :  { %v425_v62 = vmul.f32 0.5, %v424_v59  ;;  %v449_v59 = vmul.f32 %v446_v57, %v2797_v48 }
 0x10b   :  { %v435_v63 = vmul.f32 0.0, %v429_v50 }
 0x116   :  { %v411_v40 = vpop.f32.mrb[4].mxu1 }
 0x117   :  { %v420_v43 = vadd.f32 %v411_v40, %v174_v39  ;;  %v413_v44 = vpop.f32.mrb[5].mxu1 }
 0x118   :  { %v421_v45 = vadd.f32 %v413_v44, %v175_v41  ;;  %v415_v47 = vpop.f32.mrb[6].mxu1 }
 0x119   :  { %2347 = vtanh.f32 %v420_v43  ;;  %v416_v55 = vpop.f32.mrb[7].mxu1  ;;  %v2095_v47 = vld [vmem:[%s3701_s0 + $0x10] sm:$0xff] }
 0x11a   :  { %v431_v58 = vmul.f32 0.5, %v421_v45  ;;  %v3721_v45 = vmov 0   ;;  %567 = vperm.xlu1 %2246, %v2095_v47   ;;  %v2098_v55 = vld [vmem:[%s3701_s0 + $0x28] sm:$0xff] }
 0x11c   :  { %2349 = vtanh.f32 %v431_v58  ;;  %v448_v58 = vmul.f32 %v446_v57, %v2803_v51 }
 0x11e   :  { %689 = vperm.xlu1 %2246, %v2096_v53   ;;  %v452_v50 = vadd.f32 %v448_v58, %v2810_v54 }
 0x122   :  { %933 = vperm.xlu1 %2246, %v2098_v55  }
 0x123   :  { %v2348_v49 = vpop.eup %2347 }
 0x124   :  { %v436_v20 = vmul.f32 %v2348_v49, %v425_v62  ;;  %v450_v62 = vmul.f32 %v446_v57, %v2820_v2 }
 0x126   :  { %v2835_v1 = vadd.f32 %v436_v20, %v435_v63  ;;  %v2350_v26 = vpop.eup %2349  ;;  %1177 = vperm.xlu1 %2246, %v2100_v56   ;;  %v453_v20 = vadd.f32 %v449_v59, %v2806_v52  ;;  %v454_v55 = vadd.f32 %v450_v62, %v2826_v17  ;;  %v451_v56 = vmul.f32 %v446_v57, %v2823_v15 }
 0x127   :  { %v433_v39 = vadd.f32 1.0, %v2350_v26 }
 0x128   :  { %2351 = vtanh.f32 %v2835_v1  ;;  %v455_v42 = vadd.f32 %v451_v56, %v2830_v23 }
 0x129   :  { %v434_v40 = vmul.f32 0.5, %v433_v39 }
 0x132   :  { %v2352_v41 = vpop.eup %2351 }
 0x133   :  { %v2838_v43 = vmul.f32 %v2352_v41, %v434_v40 }
 0x135   :  { %3720 = vst [vmem:[#allocation8_spill] sm:$0xff] %v2838_v43  ;;  %v456_v44 = vpack.c.bf16 %v2838_v43, %v2838_v43 }
 0x137   :  { %490 = vmatmul.mubr.bf16.vlgmr.msra.gmra.mrb[0].mxu0 %v456_v44  ;;  %531 = vmatmul.mubr.bf16.vlgmr.msra.gmra.mrb[8].mxu1 %v456_v44 }
 0x138   :  { %580 = vmatpush1.bf16.msra.mxu0 %v2553_v3  ;;  %621 = vmatpush1.bf16.msra.mxu1 %v2675_v22 }
 0x139   :  { %581 = vmatprep.subr.bf16.mxu0 %v2561_v4  ;;  %622 = vmatprep.subr.bf16.mxu1 %v2685_v24 }
 0x13a   :  { %611 = vmatprep.mubr.bf16.mxu0 %v3721_v45  ;;  %652 = vmatprep.mubr.bf16.mxu1 %v3721_v45 }
 0x13c   :  { %582 = vmatpush1.bf16.msra.mxu0 %v2568_v5  ;;  %623 = vmatpush1.bf16.msra.mxu1 %v2693_v25 }
 0x13d   :  { %583 = vmatprep.subr.bf16.mxu0 %v2575_v6  ;;  %624 = vmatprep.subr.bf16.mxu1 %v2700_v27 }
 0x140   :  { %584 = vmatpush1.bf16.msra.mxu0 %v2582_v7  ;;  %625 = vmatpush1.bf16.msra.mxu1 %v2706_v28 }
 0x141   :  { %585 = vmatprep.subr.bf16.mxu0 %v2589_v8  ;;  %626 = vmatprep.subr.bf16.mxu1 %v2712_v29 }
 0x144   :  { %586 = vmatpush1.bf16.msra.mxu0 %v2596_v9  ;;  %627 = vmatpush1.bf16.msra.mxu1 %v2718_v30 }
 0x145   :  { %587 = vmatprep.subr.bf16.mxu0 %v2603_v10  ;;  %628 = vmatprep.subr.bf16.mxu1 %v2724_v31 }
 0x148   :  { %588 = vmatpush1.bf16.msra.mxu0 %v2610_v11  ;;  %629 = vmatpush1.bf16.msra.mxu1 %v2730_v32 }
 0x149   :  { %589 = vmatprep.subr.bf16.mxu0 %v2617_v12  ;;  %630 = vmatprep.subr.bf16.mxu1 %v2736_v33 }
 0x14c   :  { %590 = vmatpush1.bf16.msra.mxu0 %v2624_v13  ;;  %631 = vmatpush1.bf16.msra.mxu1 %v2742_v34 }
 0x14d   :  { %591 = vmatprep.subr.bf16.mxu0 %v2631_v14  ;;  %632 = vmatprep.subr.bf16.mxu1 %v2748_v35 }
 0x150   :  { %592 = vmatpush1.bf16.msra.mxu0 %v2641_v16  ;;  %633 = vmatpush1.bf16.msra.mxu1 %v2754_v36 }
 0x151   :  { %593 = vmatprep.subr.bf16.mxu0 %v2651_v18  ;;  %634 = vmatprep.subr.bf16.mxu1 %v2760_v37 }
 0x154   :  { %594 = vmatpush1.bf16.msra.mxu0 %v2658_v19  ;;  %635 = vmatpush1.bf16.msra.mxu1 %v2766_v38 }
 0x155   :  { %701 = vmatprep.subr.bf16.mxu0 %v2543_v0  ;;  %742 = vmatprep.subr.bf16.mxu1 %v2668_v21 }
 0x20a   :  { %v491_v49 = vpop.f32.mrb[0].mxu0  ;;  %v532_v63 = vpop.f32.mrb[8].mxu1 }
 0x20b   :  { %v539_v26 = vadd.f32 %v491_v49, %v452_v50  ;;  %v493_v39 = vpop.f32.mrb[1].mxu0  ;;  %v534_v40 = vpop.f32.mrb[9].mxu1  ;;  %v541_v60 = vadd.f32 %v532_v63, %v454_v55 }
 0x20c   :  { %v540_v41 = vadd.f32 %v493_v39, %v453_v20  ;;  %v495_v44 = vpop.f32.mrb[2].mxu0  ;;  %v536_v47 = vpop.f32.mrb[10].mxu1  ;;  %v542_v59 = vadd.f32 %v534_v40, %v455_v42 }
 0x20d   :  { %v543_v53 = vmul.f32 0.5, %v539_v26  ;;  %v496_v43 = vpop.f32.mrb[3].mxu0  ;;  %v537_v61 = vpop.f32.mrb[11].mxu1 }
 0x20e   :  { %v547_v58 = vmul.f32 0.5, %v540_v41  ;;  %v552_v50 = vmul.f32 0.5, %v542_v59 }
 0x20f   :  { %2353 = vtanh.f32 %v543_v53 }
 0x210   :  { %2355 = vtanh.f32 %v547_v58 }
 0x211   :  { %2357 = vtanh.f32 %v541_v60 }
 0x212   :  { %2359 = vtanh.f32 %v552_v50 }
 0x219   :  { %v2354_v49 = vpop.eup %2353 }
 0x21a   :  { %v2356_v20 = vpop.eup %2355  ;;  %v545_v39 = vadd.f32 1.0, %v2354_v49 }
 0x21b   :  { %v549_v44 = vadd.f32 1.0, %v2356_v20  ;;  %v2358_v62 = vpop.eup %2357 }
 0x21c   :  { %v546_v26 = vmul.f32 0.5, %v545_v39  ;;  %v2360_v63 = vpop.eup %2359 }
 0x21d   :  { %v550_v47 = vmul.f32 0.5, %v549_v44  ;;  %v554_v41 = vadd.f32 1.0, %v2360_v63 }
 0x21e   :  { %v557_v57 = vmul.f32 %v2358_v62, %v546_v26 }
 0x21f   :  { %v556_v61 = vmul.f32 %v550_v47, %v2835_v1  ;;  %v555_v60 = vmul.f32 0.5, %v554_v41  ;;  %v568_v1 = vpop.permute.xlu1 %567 }
 0x220   :  { %v570_v55 = vmul.f32 %v568_v1, %v2803_v51  ;;  %v571_v56 = vmul.f32 %v568_v1, %v2797_v48  ;;  %v572_v59 = vmul.f32 %v568_v1, %v2820_v2  ;;  %v573_v62 = vmul.f32 %v568_v1, %v2823_v15 }
 0x221   :  { %v2897_v43 = vadd.f32 %v557_v57, %v556_v61 }
 0x222   :  { %v574_v58 = vadd.f32 %v570_v55, %v2810_v54  ;;  %v575_v50 = vadd.f32 %v571_v56, %v2806_v52  ;;  %v576_v44 = vadd.f32 %v572_v59, %v2826_v17  ;;  %v577_v56 = vadd.f32 %v573_v62, %v2830_v23 }
 0x223   :  { %2361 = vtanh.f32 %v2897_v43 }
 0x22d   :  { %v2362_v42 = vpop.eup %2361 }
 0x22e   :  { %v2900_v40 = vmul.f32 %v2362_v42, %v555_v60 }
 0x230   :  { %3722 = vst [vmem:[#allocation9_spill] sm:$0xff] %v2900_v40  ;;  %v578_v53 = vpack.c.bf16 %v2900_v40, %v2900_v40 }
 0x232   :  { %612 = vmatmul.mubr.bf16.vlgmr.msra.gmra.mrb[4].mxu0 %v578_v53  ;;  %653 = vmatmul.mubr.bf16.vlgmr.msra.gmra.mrb[12].mxu1 %v578_v53 }
 0x233   :  { %702 = vmatpush1.bf16.msra.mxu0 %v2553_v3  ;;  %743 = vmatpush1.bf16.msra.mxu1 %v2675_v22 }
 0x234   :  { %703 = vmatprep.subr.bf16.mxu0 %v2561_v4  ;;  %744 = vmatprep.subr.bf16.mxu1 %v2685_v24 }
 0x235   :  { %733 = vmatprep.mubr.bf16.mxu0 %v3721_v45  ;;  %774 = vmatprep.mubr.bf16.mxu1 %v3721_v45 }
 0x237   :  { %704 = vmatpush1.bf16.msra.mxu0 %v2568_v5  ;;  %745 = vmatpush1.bf16.msra.mxu1 %v2693_v25 }
 0x238   :  { %705 = vmatprep.subr.bf16.mxu0 %v2575_v6  ;;  %746 = vmatprep.subr.bf16.mxu1 %v2700_v27 }
 0x23b   :  { %706 = vmatpush1.bf16.msra.mxu0 %v2582_v7  ;;  %747 = vmatpush1.bf16.msra.mxu1 %v2706_v28 }
 0x23c   :  { %707 = vmatprep.subr.bf16.mxu0 %v2589_v8  ;;  %748 = vmatprep.subr.bf16.mxu1 %v2712_v29 }
 0x23f   :  { %708 = vmatpush1.bf16.msra.mxu0 %v2596_v9  ;;  %749 = vmatpush1.bf16.msra.mxu1 %v2718_v30 }
 0x240   :  { %709 = vmatprep.subr.bf16.mxu0 %v2603_v10  ;;  %750 = vmatprep.subr.bf16.mxu1 %v2724_v31 }
 0x243   :  { %710 = vmatpush1.bf16.msra.mxu0 %v2610_v11  ;;  %751 = vmatpush1.bf16.msra.mxu1 %v2730_v32 }
 0x244   :  { %711 = vmatprep.subr.bf16.mxu0 %v2617_v12  ;;  %752 = vmatprep.subr.bf16.mxu1 %v2736_v33 }
 0x247   :  { %712 = vmatpush1.bf16.msra.mxu0 %v2624_v13  ;;  %753 = vmatpush1.bf16.msra.mxu1 %v2742_v34 }
 0x248   :  { %713 = vmatprep.subr.bf16.mxu0 %v2631_v14  ;;  %754 = vmatprep.subr.bf16.mxu1 %v2748_v35 }
 0x24b   :  { %714 = vmatpush1.bf16.msra.mxu0 %v2641_v16  ;;  %755 = vmatpush1.bf16.msra.mxu1 %v2754_v36 }
 0x24c   :  { %715 = vmatprep.subr.bf16.mxu0 %v2651_v18  ;;  %756 = vmatprep.subr.bf16.mxu1 %v2760_v37 }
 0x24f   :  { %716 = vmatpush1.bf16.msra.mxu0 %v2658_v19  ;;  %757 = vmatpush1.bf16.msra.mxu1 %v2766_v38 }
 0x250   :  { %823 = vmatprep.subr.bf16.mxu0 %v2543_v0  ;;  %864 = vmatprep.subr.bf16.mxu1 %v2668_v21 }
 0x305   :  { %v613_v49 = vpop.f32.mrb[4].mxu0  ;;  %v654_v20 = vpop.f32.mrb[12].mxu1 }
 0x306   :  { %v661_v39 = vadd.f32 %v613_v49, %v574_v58  ;;  %v615_v26 = vpop.f32.mrb[5].mxu0  ;;  %v656_v47 = vpop.f32.mrb[13].mxu1  ;;  %v663_v55 = vadd.f32 %v654_v20, %v576_v44 }
 0x307   :  { %v662_v57 = vadd.f32 %v615_v26, %v575_v50  ;;  %v617_v61 = vpop.f32.mrb[6].mxu0  ;;  %v658_v63 = vpop.f32.mrb[14].mxu1  ;;  %v664_v58 = vadd.f32 %v656_v47, %v577_v56 }
 0x308   :  { %v665_v41 = vmul.f32 0.5, %v661_v39  ;;  %v618_v60 = vpop.f32.mrb[7].mxu0  ;;  %v659_v42 = vpop.f32.mrb[15].mxu1 }
 0x309   :  { %v669_v53 = vmul.f32 0.5, %v662_v57  ;;  %v674_v49 = vmul.f32 0.5, %v664_v58 }
 0x30a   :  { %2363 = vtanh.f32 %v665_v41 }
 0x30b   :  { %2365 = vtanh.f32 %v669_v53 }
 0x30c   :  { %2367 = vtanh.f32 %v663_v55 }
 0x30d   :  { %2369 = vtanh.f32 %v674_v49 }
 0x314   :  { %v2364_v59 = vpop.eup %2363 }
 0x315   :  { %v2366_v40 = vpop.eup %2365  ;;  %v667_v46 = vadd.f32 1.0, %v2364_v59 }
 0x316   :  { %v671_v1 = vadd.f32 1.0, %v2366_v40  ;;  %v2368_v26 = vpop.eup %2367 }
 0x317   :  { %v668_v50 = vmul.f32 0.5, %v667_v46  ;;  %v2370_v20 = vpop.eup %2369  ;;  %v690_v46 = vpop.permute.xlu1 %689 }
 0x318   :  { %v672_v61 = vmul.f32 0.5, %v671_v1  ;;  %v676_v44 = vadd.f32 1.0, %v2370_v20  ;;  %v693_v60 = vmul.f32 %v690_v46, %v2797_v48  ;;  %v694_v53 = vmul.f32 %v690_v46, %v2820_v2 }
 0x319   :  { %v679_v39 = vmul.f32 %v2368_v26, %v668_v50  ;;  %v695_v20 = vmul.f32 %v690_v46, %v2823_v15 }
 0x31a   :  { %v678_v63 = vmul.f32 %v672_v61, %v2897_v43  ;;  %v677_v62 = vmul.f32 0.5, %v676_v44  ;;  %v692_v43 = vmul.f32 %v690_v46, %v2803_v51  ;;  %v697_v58 = vadd.f32 %v693_v60, %v2806_v52 }
 0x31c   :  { %v2947_v57 = vadd.f32 %v679_v39, %v678_v63  ;;  %v696_v42 = vadd.f32 %v692_v43, %v2810_v54  ;;  %v698_v63 = vadd.f32 %v694_v53, %v2826_v17  ;;  %v699_v43 = vadd.f32 %v695_v20, %v2830_v23 }
 0x31e   :  { %2371 = vtanh.f32 %v2947_v57 }
 0x328   :  { %v2372_v47 = vpop.eup %2371 }
 0x329   :  { %v2950_v41 = vmul.f32 %v2372_v47, %v677_v62 }
 0x32b   :  { %v700_v40 = vpack.c.bf16 %v2950_v41, %v2950_v41 }
 0x32d   :  { %734 = vmatmul.mubr.bf16.vlgmr.msra.gmra.mrb[8].mxu0 %v700_v40  ;;  %775 = vmatmul.mubr.bf16.vlgmr.msra.gmra.mrb[16].mxu1 %v700_v40 }
 0x32e   :  { %824 = vmatpush1.bf16.msra.mxu0 %v2553_v3  ;;  %865 = vmatpush1.bf16.msra.mxu1 %v2675_v22 }
 0x32f   :  { %825 = vmatprep.subr.bf16.mxu0 %v2561_v4  ;;  %866 = vmatprep.subr.bf16.mxu1 %v2685_v24 }
 0x330   :  { %855 = vmatprep.mubr.bf16.mxu0 %v3721_v45  ;;  %896 = vmatprep.mubr.bf16.mxu1 %v3721_v45 }
 0x332   :  { %826 = vmatpush1.bf16.msra.mxu0 %v2568_v5  ;;  %867 = vmatpush1.bf16.msra.mxu1 %v2693_v25 }
 0x333   :  { %827 = vmatprep.subr.bf16.mxu0 %v2575_v6  ;;  %868 = vmatprep.subr.bf16.mxu1 %v2700_v27 }
 0x336   :  { %828 = vmatpush1.bf16.msra.mxu0 %v2582_v7  ;;  %869 = vmatpush1.bf16.msra.mxu1 %v2706_v28 }
 0x337   :  { %829 = vmatprep.subr.bf16.mxu0 %v2589_v8  ;;  %870 = vmatprep.subr.bf16.mxu1 %v2712_v29 }
 0x33a   :  { %830 = vmatpush1.bf16.msra.mxu0 %v2596_v9  ;;  %871 = vmatpush1.bf16.msra.mxu1 %v2718_v30 }
 0x33b   :  { %831 = vmatprep.subr.bf16.mxu0 %v2603_v10  ;;  %872 = vmatprep.subr.bf16.mxu1 %v2724_v31 }
 0x33e   :  { %832 = vmatpush1.bf16.msra.mxu0 %v2610_v11  ;;  %873 = vmatpush1.bf16.msra.mxu1 %v2730_v32 }
 0x33f   :  { %833 = vmatprep.subr.bf16.mxu0 %v2617_v12  ;;  %874 = vmatprep.subr.bf16.mxu1 %v2736_v33 }
 0x342   :  { %834 = vmatpush1.bf16.msra.mxu0 %v2624_v13  ;;  %875 = vmatpush1.bf16.msra.mxu1 %v2742_v34 }
 0x343   :  { %835 = vmatprep.subr.bf16.mxu0 %v2631_v14  ;;  %876 = vmatprep.subr.bf16.mxu1 %v2748_v35 }
 0x346   :  { %836 = vmatpush1.bf16.msra.mxu0 %v2641_v16  ;;  %877 = vmatpush1.bf16.msra.mxu1 %v2754_v36 }
 0x347   :  { %837 = vmatprep.subr.bf16.mxu0 %v2651_v18  ;;  %878 = vmatprep.subr.bf16.mxu1 %v2760_v37 }
 0x34a   :  { %838 = vmatpush1.bf16.msra.mxu0 %v2658_v19  ;;  %879 = vmatpush1.bf16.msra.mxu1 %v2766_v38 }
 0x34b   :  { %945 = vmatprep.subr.bf16.mxu0 %v2543_v0  ;;  %986 = vmatprep.subr.bf16.mxu1 %v2668_v21 }
 0x400   :  { %v735_v55 = vpop.f32.mrb[8].mxu0  ;;  %v776_v56 = vpop.f32.mrb[16].mxu1 }
 0x401   :  { %v783_v49 = vadd.f32 %v735_v55, %v696_v42  ;;  %v737_v59 = vpop.f32.mrb[9].mxu0  ;;  %v778_v1 = vpop.f32.mrb[17].mxu1  ;;  %v785_v40 = vadd.f32 %v776_v56, %v698_v63 }
 0x402   :  { %v784_v50 = vadd.f32 %v737_v59, %v697_v58  ;;  %v739_v26 = vpop.f32.mrb[10].mxu0  ;;  %v780_v61 = vpop.f32.mrb[18].mxu1  ;;  %v786_v60 = vadd.f32 %v778_v1, %v699_v43 }
 0x403   :  { %v787_v39 = vmul.f32 0.5, %v783_v49  ;;  %v740_v44 = vpop.f32.mrb[11].mxu0  ;;  %v781_v62 = vpop.f32.mrb[19].mxu1 }
 0x404   :  { %v791_v47 = vmul.f32 0.5, %v784_v50  ;;  %v796_v42 = vmul.f32 0.5, %v786_v60 }
 0x405   :  { %2373 = vtanh.f32 %v787_v39 }
 0x406   :  { %2375 = vtanh.f32 %v791_v47 }
 0x407   :  { %2377 = vtanh.f32 %v785_v40 }
 0x408   :  { %2379 = vtanh.f32 %v796_v42 }
 0x40f   :  { %v2374_v55 = vpop.eup %2373 }
 0x410   :  { %v2376_v58 = vpop.eup %2375  ;;  %v789_v59 = vadd.f32 1.0, %v2374_v55 }
 0x411   :  { %v793_v26 = vadd.f32 1.0, %v2376_v58  ;;  %v2378_v53 = vpop.eup %2377 }
 0x412   :  { %v790_v49 = vmul.f32 0.5, %v789_v59  ;;  %v2380_v56 = vpop.eup %2379 }
 0x413   :  { %v794_v61 = vmul.f32 0.5, %v793_v26  ;;  %v798_v39 = vadd.f32 1.0, %v2380_v56 }
 0x414   :  { %v801_v46 = vmul.f32 %v2378_v53, %v790_v49 }
 0x415   :  { %v800_v44 = vmul.f32 %v794_v61, %v2947_v57  ;;  %v799_v63 = vmul.f32 0.5, %v798_v39 }
 0x417   :  { %v2997_v50 = vadd.f32 %v801_v46, %v800_v44 }
 0x419   :  { %2381 = vtanh.f32 %v2997_v50 }
 0x423   :  { %v2382_v1 = vpop.eup %2381 }
 0x424   :  { %v3000_v20 = vmul.f32 %v2382_v1, %v799_v63 }
 0x426   :  { %v822_v62 = vpack.c.bf16 %v3000_v20, %v3000_v20 }
 0x428   :  { %856 = vmatmul.mubr.bf16.vlgmr.msra.gmra.mrb[12].mxu0 %v822_v62  ;;  %897 = vmatmul.mubr.bf16.vlgmr.msra.gmra.mrb[20].mxu1 %v822_v62 }
 0x429   :  { %946 = vmatpush1.bf16.msra.mxu0 %v2553_v3  ;;  %987 = vmatpush1.bf16.msra.mxu1 %v2675_v22  ;;  %v812_v3 = vpop.permute.xlu0 %811 }
 0x42a   :  { %947 = vmatprep.subr.bf16.mxu0 %v2561_v4  ;;  %988 = vmatprep.subr.bf16.mxu1 %v2685_v24  ;;  %v814_v4 = vmul.f32 %v812_v3, %v2803_v51  ;;  %v817_v55 = vmul.f32 %v812_v3, %v2823_v15 }
 0x42b   :  { %977 = vmatprep.mubr.bf16.mxu0 %v3721_v45  ;;  %1018 = vmatprep.mubr.bf16.mxu1 %v3721_v45 }
 0x42c   :  { %v821_v53 = vadd.f32 %v817_v55, %v2830_v23 }
 0x42d   :  { %948 = vmatpush1.bf16.msra.mxu0 %v2568_v5  ;;  %989 = vmatpush1.bf16.msra.mxu1 %v2693_v25  ;;  %v815_v5 = vmul.f32 %v812_v3, %v2797_v48 }
 0x42e   :  { %949 = vmatprep.subr.bf16.mxu0 %v2575_v6  ;;  %990 = vmatprep.subr.bf16.mxu1 %v2700_v27  ;;  %v818_v6 = vadd.f32 %v814_v4, %v2810_v54 }
 0x431   :  { %950 = vmatpush1.bf16.msra.mxu0 %v2582_v7  ;;  %991 = vmatpush1.bf16.msra.mxu1 %v2706_v28  ;;  %v816_v7 = vmul.f32 %v812_v3, %v2820_v2 }
 0x432   :  { %951 = vmatprep.subr.bf16.mxu0 %v2589_v8  ;;  %992 = vmatprep.subr.bf16.mxu1 %v2712_v29 }
 0x433   :  { %v820_v42 = vadd.f32 %v816_v7, %v2826_v17 }
 0x435   :  { %952 = vmatpush1.bf16.msra.mxu0 %v2596_v9  ;;  %993 = vmatpush1.bf16.msra.mxu1 %v2718_v30 }
 0x436   :  { %953 = vmatprep.subr.bf16.mxu0 %v2603_v10  ;;  %994 = vmatprep.subr.bf16.mxu1 %v2724_v31  ;;  %v819_v10 = vadd.f32 %v815_v5, %v2806_v52 }
 0x439   :  { %954 = vmatpush1.bf16.msra.mxu0 %v2610_v11  ;;  %995 = vmatpush1.bf16.msra.mxu1 %v2730_v32 }
 0x43a   :  { %955 = vmatprep.subr.bf16.mxu0 %v2617_v12  ;;  %996 = vmatprep.subr.bf16.mxu1 %v2736_v33 }
 0x43d   :  { %956 = vmatpush1.bf16.msra.mxu0 %v2624_v13  ;;  %997 = vmatpush1.bf16.msra.mxu1 %v2742_v34 }
 0x43e   :  { %957 = vmatprep.subr.bf16.mxu0 %v2631_v14  ;;  %998 = vmatprep.subr.bf16.mxu1 %v2748_v35 }
 0x441   :  { %958 = vmatpush1.bf16.msra.mxu0 %v2641_v16  ;;  %999 = vmatpush1.bf16.msra.mxu1 %v2754_v36 }
 0x442   :  { %959 = vmatprep.subr.bf16.mxu0 %v2651_v18  ;;  %1000 = vmatprep.subr.bf16.mxu1 %v2760_v37 }
 0x445   :  { %960 = vmatpush1.bf16.msra.mxu0 %v2658_v19  ;;  %1001 = vmatpush1.bf16.msra.mxu1 %v2766_v38 }
 0x446   :  { %1067 = vmatprep.subr.bf16.mxu0 %v2543_v0  ;;  %1108 = vmatprep.subr.bf16.mxu1 %v2668_v21 }
 0x4fb   :  { %v857_v8 = vpop.f32.mrb[12].mxu0  ;;  %v898_v9 = vpop.f32.mrb[20].mxu1 }
 0x4fc   :  { %v905_v11 = vadd.f32 %v857_v8, %v818_v6  ;;  %v859_v57 = vpop.f32.mrb[13].mxu0  ;;  %v900_v47 = vpop.f32.mrb[21].mxu1  ;;  %v907_v49 = vadd.f32 %v898_v9, %v820_v42 }
 0x4fd   :  { %v906_v40 = vadd.f32 %v859_v57, %v819_v10  ;;  %v861_v0 = vpop.f32.mrb[14].mxu0  ;;  %v902_v43 = vpop.f32.mrb[22].mxu1  ;;  %v908_v61 = vadd.f32 %v900_v47, %v821_v53  ;;  %v3057_v47 = vld [vmem:[%s3699_s2] ss:$16 sps:$4 sm:$0xff]  }
 0x4fe   :  { %v909_v60 = vmul.f32 0.5, %v905_v11  ;;  %v862_v58 = vpop.f32.mrb[15].mxu0  ;;  %v903_v59 = vpop.f32.mrb[23].mxu1 }
 0x4ff   :  { %v913_v26 = vmul.f32 0.5, %v906_v40  ;;  %v918_v46 = vmul.f32 0.5, %v908_v61  ;;  %v3073_v40 = vld [vmem:[%s3699_s2 + $0x20] ss:$16 sps:$4 sm:$0xff]  }
 0x500   :  { %2383 = vtanh.f32 %v909_v60 }
 0x501   :  { %2385 = vtanh.f32 %v913_v26 }
 0x502   :  { %2387 = vtanh.f32 %v907_v49 }
 0x503   :  { %2389 = vtanh.f32 %v918_v46 }
 0x50a   :  { %v2384_v44 = vpop.eup %2383 }
 0x50b   :  { %v2386_v56 = vpop.eup %2385  ;;  %v911_v39 = vadd.f32 1.0, %v2384_v44 }
 0x50c   :  { %v915_v63 = vadd.f32 1.0, %v2386_v56  ;;  %v2388_v62 = vpop.eup %2387 }
 0x50d   :  { %v912_v1 = vmul.f32 0.5, %v911_v39  ;;  %v2390_v7 = vpop.eup %2389 }
 0x50e   :  { %v916_v4 = vmul.f32 0.5, %v915_v63  ;;  %v920_v8 = vadd.f32 1.0, %v2390_v7 }
 0x50f   :  { %v923_v3 = vmul.f32 %v2388_v62, %v912_v1 }
 0x510   :  { %v922_v5 = vmul.f32 %v916_v4, %v2997_v50  ;;  %v921_v9 = vmul.f32 0.5, %v920_v8  ;;  %v3064_v50 = vld [vmem:[%s3699_s2 + $0x24] ss:$16 sps:$4 sm:$0xff]  }
 0x512   :  { %v3047_v6 = vadd.f32 %v923_v3, %v922_v5 }
 0x514   :  { %2391 = vtanh.f32 %v3047_v6 }
 0x51e   :  { %v2392_v10 = vpop.eup %2391 }
 0x51f   :  { %v3050_v11 = vmul.f32 %v2392_v10, %v921_v9 }
 0x521   :  { %v944_v57 = vpack.c.bf16 %v3050_v11, %v3050_v11 }
 0x523   :  { %978 = vmatmul.mubr.bf16.vlgmr.msra.gmra.mrb[16].mxu0 %v944_v57  ;;  %1019 = vmatmul.mubr.bf16.vlgmr.msra.gmra.mrb[24].mxu1 %v944_v57  ;;  %v2474_v57 = vld [vmem:[%s3699_s2 + $0x2c] ss:$16 sps:$4 sm:$0xff]  }
 0x524   :  { %1068 = vmatpush1.bf16.msra.mxu0 %v3057_v47  ;;  %1109 = vmatpush1.bf16.msra.mxu1 %v2675_v22  ;;  %v3080_v22 = vld [vmem:[%s3699_s2 + $0x44] ss:$16 sps:$4 sm:$0xff]  }
 0x525   :  { %1069 = vmatprep.subr.bf16.mxu0 %v3064_v50  ;;  %1110 = vmatprep.subr.bf16.mxu1 %v2685_v24  ;;  %v3087_v24 = vld [vmem:[%s3699_s2 + $0x40] ss:$16 sps:$4 sm:$0xff]  }
 0x526   :  { %1099 = vmatprep.mubr.bf16.mxu0 %v3721_v45  ;;  %1140 = vmatprep.mubr.bf16.mxu1 %v3721_v45 }
 0x528   :  { %1070 = vmatpush1.bf16.msra.mxu0 %v3073_v40  ;;  %1111 = vmatpush1.bf16.msra.mxu1 %v2693_v25  ;;  %v3094_v25 = vld [vmem:[%s3699_s2 + $0x64] ss:$16 sps:$4 sm:$0xff]  }
 0x529   :  { %1071 = vmatprep.subr.bf16.mxu0 %v3080_v22  ;;  %1112 = vmatprep.subr.bf16.mxu1 %v2700_v27  ;;  %v3101_v27 = vld [vmem:[%s3699_s2 + $0x60] ss:$16 sps:$4 sm:$0xff]  }
 0x52c   :  { %1072 = vmatpush1.bf16.msra.mxu0 %v3087_v24  ;;  %1113 = vmatpush1.bf16.msra.mxu1 %v2706_v28  ;;  %v3108_v28 = vld [vmem:[%s3699_s2 + $0x84] ss:$16 sps:$4 sm:$0xff]  }
 0x52d   :  { %1073 = vmatprep.subr.bf16.mxu0 %v3094_v25  ;;  %1114 = vmatprep.subr.bf16.mxu1 %v2712_v29  ;;  %v3115_v29 = vld [vmem:[%s3699_s2 + $0x80] ss:$16 sps:$4 sm:$0xff]  }
 0x530   :  { %1074 = vmatpush1.bf16.msra.mxu0 %v3101_v27  ;;  %1115 = vmatpush1.bf16.msra.mxu1 %v2718_v30 }
 0x531   :  { %1075 = vmatprep.subr.bf16.mxu0 %v3108_v28  ;;  %1116 = vmatprep.subr.bf16.mxu1 %v2724_v31 }
 0x534   :  { %1076 = vmatpush1.bf16.msra.mxu0 %v3115_v29  ;;  %1117 = vmatpush1.bf16.msra.mxu1 %v2730_v32 }
 0x535   :  { %1077 = vmatprep.subr.bf16.mxu0 %v2617_v12  ;;  %1118 = vmatprep.subr.bf16.mxu1 %v2736_v33  ;;  %v2472_v12 = vld [vmem:[%s3699_s2 + $0x4] ss:$16 sps:$4 sm:$0xff]  }
 0x538   :  { %1078 = vmatpush1.bf16.msra.mxu0 %v2624_v13  ;;  %1119 = vmatpush1.bf16.msra.mxu1 %v2742_v34  ;;  %v934_v13 = vpop.permute.xlu1 %933 }
 0x539   :  { %1079 = vmatprep.subr.bf16.mxu0 %v2631_v14  ;;  %1120 = vmatprep.subr.bf16.mxu1 %v2748_v35  ;;  %v936_v14 = vmul.f32 %v934_v13, %v2803_v51  ;;  %v938_v30 = vmul.f32 %v934_v13, %v2820_v2  ;;  %v939_v43 = vmul.f32 %v934_v13, %v2823_v15 }
 0x53b   :  { %v942_v0 = vadd.f32 %v938_v30, %v2826_v17  ;;  %v943_v59 = vadd.f32 %v939_v43, %v2830_v23  ;;  %v2489_v30 = vld [vmem:[%s3699_s2 + $0xc8] ss:$16 sps:$4 sm:$0xff]  }
 0x53c   :  { %1080 = vmatpush1.bf16.msra.mxu0 %v2641_v16  ;;  %1121 = vmatpush1.bf16.msra.mxu1 %v2754_v36  ;;  %v937_v16 = vmul.f32 %v934_v13, %v2797_v48  ;;  %v2484_v13 = vld [vmem:[%s3699_s2 + $0xa0] ss:$16 sps:$4 sm:$0xff]  }
 0x53d   :  { %1081 = vmatprep.subr.bf16.mxu0 %v2651_v18  ;;  %1122 = vmatprep.subr.bf16.mxu1 %v2760_v37  ;;  %v940_v18 = vadd.f32 %v936_v14, %v2810_v54  ;;  %v2486_v14 = vld [vmem:[%s3699_s2 + $0xc4] ss:$16 sps:$4 sm:$0xff]  }
 0x53e   :  { %v941_v32 = vadd.f32 %v937_v16, %v2806_v52  ;;  %v2487_v16 = vld [vmem:[%s3699_s2 + $0xcc] ss:$16 sps:$4 sm:$0xff]  }
 0x540   :  { %1082 = vmatpush1.bf16.msra.mxu0 %v2658_v19  ;;  %1123 = vmatpush1.bf16.msra.mxu1 %v2766_v38 }
 0x541   :  { %1189 = vmatprep.subr.bf16.mxu0 %v2472_v12  ;;  %1230 = vmatprep.subr.bf16.mxu1 %v2668_v21  ;;  %v2477_v12 = vld [vmem:[%s3699_s2 + $0x48] ss:$16 sps:$4 sm:$0xff]  }
 0x5f6   :  { %v979_v31 = vpop.f32.mrb[16].mxu0  ;;  %v1020_v19 = vpop.f32.mrb[24].mxu1 }
 0x5f7   :  { %v1027_v33 = vadd.f32 %v979_v31, %v940_v18  ;;  %v981_v34 = vpop.f32.mrb[17].mxu0  ;;  %v1022_v35 = vpop.f32.mrb[25].mxu1  ;;  %v1029_v58 = vadd.f32 %v1020_v19, %v942_v0  ;;  %v2488_v18 = vld [vmem:[%s3699_s2 + $0xc0] ss:$16 sps:$4 sm:$0xff]   ;;  %v2490_v31 = vld [vmem:[%s3699_s2 + $0xe4] ss:$16 sps:$4 sm:$0xff]  }
 0x5f8   :  { %v1028_v36 = vadd.f32 %v981_v34, %v941_v32  ;;  %v983_v37 = vpop.f32.mrb[18].mxu0  ;;  %v1024_v38 = vpop.f32.mrb[26].mxu1  ;;  %v1030_v26 = vadd.f32 %v1022_v35, %v943_v59  ;;  %v2491_v19 = vld [vmem:[%s3699_s2 + $0xec] ss:$16 sps:$4 sm:$0xff]   ;;  %v2492_v32 = vld [vmem:[%s3699_s2 + $0xe0] ss:$16 sps:$4 sm:$0xff]  }
 0x5f9   :  { %v1031_v21 = vmul.f32 0.5, %v1027_v33  ;;  %v984_v60 = vpop.f32.mrb[19].mxu0  ;;  %v1025_v42 = vpop.f32.mrb[27].mxu1  ;;  %v2493_v33 = vld [vmem:[%s3699_s2 + $0xe8] ss:$16 sps:$4 sm:$0xff]  }
 0x5fa   :  { %v1035_v55 = vmul.f32 0.5, %v1028_v36  ;;  %v1040_v49 = vmul.f32 0.5, %v1030_v26  ;;  %v1056_v34 = vpop.permute.xlu0 %1055 }
 0x5fb   :  { %2393 = vtanh.f32 %v1031_v21  ;;  %v1058_v35 = vmul.f32 %v1056_v34, %v2803_v51  ;;  %v1059_v36 = vmul.f32 %v1056_v34, %v2797_v48  ;;  %v1060_v38 = vmul.f32 %v1056_v34, %v2820_v2 }
 0x5fc   :  { %2395 = vtanh.f32 %v1035_v55 }
 0x5fd   :  { %2397 = vtanh.f32 %v1029_v58  ;;  %v1062_v37 = vadd.f32 %v1058_v35, %v2810_v54  ;;  %v1063_v43 = vadd.f32 %v1059_v36, %v2806_v52  ;;  %v3318_v35 = vld [vmem:[%s3704_s4 + $0x64] ss:$16 sps:$4 sm:$0xff]   ;;  %v3323_v36 = vld [vmem:[%s3704_s4 + $0x6c] ss:$16 sps:$4 sm:$0xff]  }
 0x5fe   :  { %2399 = vtanh.f32 %v1040_v49 }
 0x605   :  { %v2394_v53 = vpop.eup %2393 }
 0x606   :  { %v2396_v61 = vpop.eup %2395  ;;  %v1033_v46 = vadd.f32 1.0, %v2394_v53  ;;  %v1064_v53 = vadd.f32 %v1060_v38, %v2826_v17  ;;  %v3333_v38 = vld [vmem:[%s3704_s4 + $0x68] ss:$16 sps:$4 sm:$0xff]  }
 0x607   :  { %v1037_v44 = vadd.f32 1.0, %v2396_v61  ;;  %v2398_v39 = vpop.eup %2397  ;;  %v1061_v61 = vmul.f32 %v1056_v34, %v2823_v15  ;;  %v3309_v34 = vld [vmem:[%s3704_s4 + $0x48] ss:$16 sps:$4 sm:$0xff]  }
 0x608   :  { %v1034_v56 = vmul.f32 0.5, %v1033_v46  ;;  %v2400_v3 = vpop.eup %2399 }
 0x609   :  { %v1038_v63 = vmul.f32 0.5, %v1037_v44  ;;  %v1042_v5 = vadd.f32 1.0, %v2400_v3 }
 0x60a   :  { %v1045_v1 = vmul.f32 %v2398_v39, %v1034_v56 }
 0x60b   :  { %v1044_v62 = vmul.f32 %v1038_v63, %v3047_v6  ;;  %v1043_v7 = vmul.f32 0.5, %v1042_v5  ;;  %v2473_v6 = vld [vmem:[%s3699_s2 + $0x8] ss:$16 sps:$4 sm:$0xff]   ;;  %v1065_v63 = vadd.f32 %v1061_v61, %v2830_v23 }
 0x60c   :  { %v3405_v61 = vld [vmem:[%s3704_s4 + $0xc8] ss:$16 sps:$4 sm:$0xff]  }
 0x60d   :  { %v3144_v4 = vadd.f32 %v1045_v1, %v1044_v62 }
 0x60f   :  { %2401 = vtanh.f32 %v3144_v4 }
 0x619   :  { %v2402_v8 = vpop.eup %2401 }
 0x61a   :  { %v3147_v9 = vmul.f32 %v2402_v8, %v1043_v7 }
 0x61c   :  { %v1066_v10 = vpack.c.bf16 %v3147_v9, %v3147_v9 }
 0x61e   :  { %1100 = vmatmul.mubr.bf16.vlgmr.msra.gmra.mrb[20].mxu0 %v1066_v10  ;;  %1141 = vmatmul.mubr.bf16.vlgmr.msra.gmra.mrb[28].mxu1 %v1066_v10 }
 0x61f   :  { %1190 = vmatpush1.bf16.msra.mxu0 %v3057_v47  ;;  %1231 = vmatpush1.bf16.msra.mxu1 %v2473_v6  ;;  %v2475_v47 = vld [vmem:[%s3699_s2 + $0x28] ss:$16 sps:$4 sm:$0xff]  }
 0x620   :  { %1191 = vmatprep.subr.bf16.mxu0 %v3064_v50  ;;  %1232 = vmatprep.subr.bf16.mxu1 %v2474_v57  ;;  %v2476_v50 = vld [vmem:[%s3699_s2 + $0x4c] ss:$16 sps:$4 sm:$0xff]  }
 0x621   :  { %1221 = vmatprep.mubr.bf16.mxu0 %v3721_v45  ;;  %1262 = vmatprep.mubr.bf16.mxu1 %v3721_v45 }
 0x623   :  { %1192 = vmatpush1.bf16.msra.mxu0 %v3073_v40  ;;  %1233 = vmatpush1.bf16.msra.mxu1 %v2475_v47  ;;  %v2478_v40 = vld [vmem:[%s3699_s2 + $0x6c] ss:$16 sps:$4 sm:$0xff]  }
 0x624   :  { %1193 = vmatprep.subr.bf16.mxu0 %v3080_v22  ;;  %1234 = vmatprep.subr.bf16.mxu1 %v2476_v50  ;;  %v2479_v22 = vld [vmem:[%s3699_s2 + $0x68] ss:$16 sps:$4 sm:$0xff]  }
 0x627   :  { %1194 = vmatpush1.bf16.msra.mxu0 %v3087_v24  ;;  %1235 = vmatpush1.bf16.msra.mxu1 %v2477_v12  ;;  %v2480_v24 = vld [vmem:[%s3699_s2 + $0x8c] ss:$16 sps:$4 sm:$0xff]  }
 0x628   :  { %1195 = vmatprep.subr.bf16.mxu0 %v3094_v25  ;;  %1236 = vmatprep.subr.bf16.mxu1 %v2478_v40  ;;  %v2481_v25 = vld [vmem:[%s3699_s2 + $0x88] ss:$16 sps:$4 sm:$0xff]  }
 0x62b   :  { %1196 = vmatpush1.bf16.msra.mxu0 %v3101_v27  ;;  %1237 = vmatpush1.bf16.msra.mxu1 %v2479_v22  ;;  %v2482_v27 = vld [vmem:[%s3699_s2 + $0xa4] ss:$16 sps:$4 sm:$0xff]  }
 0x62c   :  { %1197 = vmatprep.subr.bf16.mxu0 %v3108_v28  ;;  %1238 = vmatprep.subr.bf16.mxu1 %v2480_v24  ;;  %v2483_v28 = vld [vmem:[%s3699_s2 + $0xac] ss:$16 sps:$4 sm:$0xff]  }
 0x62f   :  { %1198 = vmatpush1.bf16.msra.mxu0 %v3115_v29  ;;  %1239 = vmatpush1.bf16.msra.mxu1 %v2481_v25  ;;  %v2485_v29 = vld [vmem:[%s3699_s2 + $0xa8] ss:$16 sps:$4 sm:$0xff]  }
 0x630   :  { %1199 = vmatprep.subr.bf16.mxu0 %v2482_v27  ;;  %1240 = vmatprep.subr.bf16.mxu1 %v2483_v28 }
 0x633   :  { %1200 = vmatpush1.bf16.msra.mxu0 %v2484_v13  ;;  %1241 = vmatpush1.bf16.msra.mxu1 %v2485_v29  ;;  %v3251_v13 = vld [vmem:[%s3704_s4 + $0xc] ss:$16 sps:$4 sm:$0xff]   ;;  %v3257_v29 = vld [vmem:[%s3704_s4] ss:$16 sps:$4 sm:$0xff]  }
 0x634   :  { %1201 = vmatprep.subr.bf16.mxu0 %v2486_v14  ;;  %1242 = vmatprep.subr.bf16.mxu1 %v2487_v16  ;;  %v3262_v14 = vld [vmem:[%s3704_s4 + $0x8] ss:$16 sps:$4 sm:$0xff]   ;;  %v3270_v16 = vld [vmem:[%s3704_s4 + $0x24] ss:$16 sps:$4 sm:$0xff]  }
 0x637   :  { %1202 = vmatpush1.bf16.msra.mxu0 %v2488_v18  ;;  %1243 = vmatpush1.bf16.msra.mxu1 %v2489_v30  ;;  %v3275_v18 = vld [vmem:[%s3704_s4 + $0x2c] ss:$16 sps:$4 sm:$0xff]   ;;  %v3280_v30 = vld [vmem:[%s3704_s4 + $0x20] ss:$16 sps:$4 sm:$0xff]  }
 0x638   :  { %1203 = vmatprep.subr.bf16.mxu0 %v2490_v31  ;;  %1244 = vmatprep.subr.bf16.mxu1 %v2491_v19  ;;  %v3285_v31 = vld [vmem:[%s3704_s4 + $0x28] ss:$16 sps:$4 sm:$0xff]   ;;  %v3294_v19 = vld [vmem:[%s3704_s4 + $0x44] ss:$16 sps:$4 sm:$0xff]  }
 0x63b   :  { %1204 = vmatpush1.bf16.msra.mxu0 %v2492_v32  ;;  %1245 = vmatpush1.bf16.msra.mxu1 %v2493_v33  ;;  %v3299_v32 = vld [vmem:[%s3704_s4 + $0x4c] ss:$16 sps:$4 sm:$0xff]   ;;  %v3304_v33 = vld [vmem:[%s3704_s4 + $0x40] ss:$16 sps:$4 sm:$0xff]  }
 0x63c   :  { %1497 = vmatprep.subr.bf16.mxu1 %v3251_v13 }
 0x6f1   :  { %v1101_v21 = vpop.f32.mrb[20].mxu0  ;;  %v1142_v0 = vpop.f32.mrb[28].mxu1 }
 0x6f2   :  { %v1149_v60 = vadd.f32 %v1101_v21, %v1062_v37  ;;  %v1103_v42 = vpop.f32.mrb[21].mxu0  ;;  %v1144_v55 = vpop.f32.mrb[29].mxu1  ;;  %v1151_v39 = vadd.f32 %v1142_v0, %v1064_v53  ;;  %v3328_v37 = vld [vmem:[%s3704_s4 + $0x60] ss:$16 sps:$4 sm:$0xff]   ;;  %v3342_v21 = vld [vmem:[%s3704_s4 + $0x84] ss:$16 sps:$4 sm:$0xff]  }
 0x6f3   :  { %v1150_v58 = vadd.f32 %v1103_v42, %v1063_v43  ;;  %v1105_v59 = vpop.f32.mrb[22].mxu0  ;;  %v1146_v26 = vpop.f32.mrb[30].mxu1  ;;  %v1152_v1 = vadd.f32 %v1144_v55, %v1065_v63  ;;  %v3347_v0 = vld [vmem:[%s3704_s4 + $0x8c] ss:$16 sps:$4 sm:$0xff]   ;;  %v3352_v43 = vld [vmem:[%s3704_s4 + $0x80] ss:$16 sps:$4 sm:$0xff]  }
 0x6f4   :  { %v1153_v49 = vmul.f32 0.5, %v1149_v60  ;;  %v1106_v46 = vpop.f32.mrb[23].mxu0  ;;  %v1147_v44 = vpop.f32.mrb[31].mxu1  ;;  %v3357_v60 = vld [vmem:[%s3704_s4 + $0x88] ss:$16 sps:$4 sm:$0xff]  }
 0x6f5   :  { %v1157_v56 = vmul.f32 0.5, %v1150_v58  ;;  %v1162_v62 = vmul.f32 0.5, %v1152_v1  ;;  %v3366_v42 = vld [vmem:[%s3704_s4 + $0xa4] ss:$16 sps:$4 sm:$0xff]   ;;  %v3371_v55 = vld [vmem:[%s3704_s4 + $0xac] ss:$16 sps:$4 sm:$0xff]   ;;  %v1178_v63 = vpop.permute.xlu1 %1177 }
 0x6f6   :  { %2403 = vtanh.f32 %v1153_v49  ;;  %v3376_v58 = vld [vmem:[%s3704_s4 + $0xa0] ss:$16 sps:$4 sm:$0xff]   ;;  %v3381_v59 = vld [vmem:[%s3704_s4 + $0xa8] ss:$16 sps:$4 sm:$0xff]   ;;  %v3390_v26 = vld [vmem:[%s3704_s4 + $0xc4] ss:$16 sps:$4 sm:$0xff]   ;;  %v1180_v1 = vmul.f32 %v1178_v63, %v2803_v51 }
 0x6f7   :  { %2405 = vtanh.f32 %v1157_v56  ;;  %v3395_v49 = vld [vmem:[%s3704_s4 + $0xcc] ss:$16 sps:$4 sm:$0xff]   ;;  %v3400_v53 = vld [vmem:[%s3704_s4 + $0xc0] ss:$16 sps:$4 sm:$0xff]   ;;  %v3414_v46 = vld [vmem:[%s3704_s4 + $0xe4] ss:$16 sps:$4 sm:$0xff]  }
 0x6f8   :  { %2407 = vtanh.f32 %v1151_v39  ;;  %v3419_v44 = vld [vmem:[%s3704_s4 + $0xec] ss:$16 sps:$4 sm:$0xff]   ;;  %v3424_v56 = vld [vmem:[%s3704_s4 + $0xe0] ss:$16 sps:$4 sm:$0xff]   ;;  %v3429_v39 = vld [vmem:[%s3704_s4 + $0xe8] ss:$16 sps:$4 sm:$0xff]  }
 0x6f9   :  { %2409 = vtanh.f32 %v1162_v62  ;;  %v1181_v62 = vmul.f32 %v1178_v63, %v2797_v48 }
 0x700   :  { %v2404_v3 = vpop.eup %2403 }
 0x701   :  { %v2406_v5 = vpop.eup %2405  ;;  %v1155_v7 = vadd.f32 1.0, %v2404_v3  ;;  %v1182_v3 = vmul.f32 %v1178_v63, %v2820_v2 }
 0x702   :  { %v1159_v8 = vadd.f32 1.0, %v2406_v5  ;;  %v2408_v6 = vpop.eup %2407  ;;  %v1184_v5 = vadd.f32 %v1180_v1, %v2810_v54 }
 0x703   :  { %v1156_v10 = vmul.f32 0.5, %v1155_v7  ;;  %v2410_v40 = vpop.eup %2409  ;;  %v1186_v51 = vadd.f32 %v1182_v3, %v2826_v17 }
 0x704   :  { %v1160_v57 = vmul.f32 0.5, %v1159_v8  ;;  %v1164_v22 = vadd.f32 1.0, %v2410_v40 }
 0x705   :  { %v1167_v47 = vmul.f32 %v2408_v6, %v1156_v10  ;;  %v1185_v10 = vadd.f32 %v1181_v62, %v2806_v52 }
 0x706   :  { %v1166_v50 = vmul.f32 %v1160_v57, %v3144_v4  ;;  %v1165_v24 = vmul.f32 0.5, %v1164_v22  ;;  %v3246_v4 = vld [vmem:[%s3704_s4 + $0x4] ss:$16 sps:$4 sm:$0xff]  }
 0x707   :  { %1456 = vmatprep.subr.bf16.mxu0 %v3246_v4 }
 0x708   :  { %v3234_v12 = vadd.f32 %v1167_v47, %v1166_v50 }
 0x70a   :  { %2411 = vtanh.f32 %v3234_v12 }
 0x714   :  { %v2412_v25 = vpop.eup %2411 }
 0x715   :  { %v3237_v27 = vmul.f32 %v2412_v25, %v1165_v24  ;;  %v1183_v24 = vmul.f32 %v1178_v63, %v2823_v15 }
 0x717   :  { %v1188_v28 = vpack.c.bf16 %v3237_v27, %v3237_v27  ;;  %v1187_v1 = vadd.f32 %v1183_v24, %v2830_v23 }
 0x719   :  { %1222 = vmatmul.mubr.bf16.vlgmr.msra.gmra.mrb[24].mxu0 %v1188_v28  ;;  %1263 = vmatmul.mubr.bf16.vlgmr.msra.gmra.mrb[32].mxu1 %v1188_v28 }
 0x71a   :  { %1488 = vmatprep.mubr.bf16.mxu0 %v3721_v45  ;;  %1529 = vmatprep.mubr.bf16.mxu1 %v3721_v45 }
 0x71b   :  { %1457 = vmatpush1.bf16.msra.mxu0 %v3257_v29  ;;  %1498 = vmatpush1.bf16.msra.mxu1 %v3262_v14 }
 0x71c   :  { %1458 = vmatprep.subr.bf16.mxu0 %v3270_v16  ;;  %1499 = vmatprep.subr.bf16.mxu1 %v3275_v18 }
 0x71f   :  { %1459 = vmatpush1.bf16.msra.mxu0 %v3280_v30  ;;  %1500 = vmatpush1.bf16.msra.mxu1 %v3285_v31 }
 0x720   :  { %1460 = vmatprep.subr.bf16.mxu0 %v3294_v19  ;;  %1501 = vmatprep.subr.bf16.mxu1 %v3299_v32 }
 0x723   :  { %1461 = vmatpush1.bf16.msra.mxu0 %v3304_v33  ;;  %1502 = vmatpush1.bf16.msra.mxu1 %v3309_v34 }
 0x724   :  { %1462 = vmatprep.subr.bf16.mxu0 %v3318_v35  ;;  %1503 = vmatprep.subr.bf16.mxu1 %v3323_v36 }
 0x727   :  { %1463 = vmatpush1.bf16.msra.mxu0 %v3328_v37  ;;  %1504 = vmatpush1.bf16.msra.mxu1 %v3333_v38 }
 0x728   :  { %1464 = vmatprep.subr.bf16.mxu0 %v3342_v21  ;;  %1505 = vmatprep.subr.bf16.mxu1 %v3347_v0 }
 0x72b   :  { %1465 = vmatpush1.bf16.msra.mxu0 %v3352_v43  ;;  %1506 = vmatpush1.bf16.msra.mxu1 %v3357_v60 }
 0x72c   :  { %1466 = vmatprep.subr.bf16.mxu0 %v3366_v42  ;;  %1507 = vmatprep.subr.bf16.mxu1 %v3371_v55 }
 0x72f   :  { %1467 = vmatpush1.bf16.msra.mxu0 %v3376_v58  ;;  %1508 = vmatpush1.bf16.msra.mxu1 %v3381_v59 }
 0x730   :  { %1468 = vmatprep.subr.bf16.mxu0 %v3390_v26  ;;  %1509 = vmatprep.subr.bf16.mxu1 %v3395_v49 }
 0x733   :  { %1469 = vmatpush1.bf16.msra.mxu0 %v3400_v53  ;;  %1510 = vmatpush1.bf16.msra.mxu1 %v3405_v61 }
 0x734   :  { %1470 = vmatprep.subr.bf16.mxu0 %v3414_v46  ;;  %1511 = vmatprep.subr.bf16.mxu1 %v3419_v44 }
 0x737   :  { %1471 = vmatpush1.bf16.msra.mxu0 %v3424_v56  ;;  %1512 = vmatpush1.bf16.msra.mxu1 %v3429_v39 }
 0x738   :  { %1563 = vmatprep.subr.bf16.mxu0 %v3246_v4  ;;  %1604 = vmatprep.subr.bf16.mxu1 %v3251_v13 }
 0x7ec   :  { %v1223_v7 = vpop.f32.mrb[24].mxu0  ;;  %v1264_v8 = vpop.f32.mrb[32].mxu1 }
 0x7ed   :  { %v1271_v6 = vadd.f32 %v1223_v7, %v1184_v5  ;;  %v1225_v57 = vpop.f32.mrb[25].mxu0  ;;  %v1266_v47 = vpop.f32.mrb[33].mxu1  ;;  %v1273_v54 = vadd.f32 %v1264_v8, %v1186_v51 }
 0x7ee   :  { %v1272_v50 = vadd.f32 %v1225_v57, %v1185_v10  ;;  %v1227_v40 = vpop.f32.mrb[26].mxu0  ;;  %v1268_v22 = vpop.f32.mrb[34].mxu1  ;;  %v1274_v52 = vadd.f32 %v1266_v47, %v1187_v1 }
 0x7ef   :  { %v1275_v25 = vmul.f32 0.5, %v1271_v6  ;;  %v1228_v48 = vpop.f32.mrb[27].mxu0  ;;  %v1269_v28 = vpop.f32.mrb[35].mxu1 }
 0x7f0   :  { %v1279_v2 = vmul.f32 0.5, %v1272_v50  ;;  %v1284_v62 = vmul.f32 0.5, %v1274_v52  ;;  %v3724_v48 = vld [vmem:[#allocation4_spill] sm:$0xff]  ;;  %v3725_v52 = vld [vmem:[#allocation6_spill] sm:$0xff] }
 0x7f1   :  { %2413 = vtanh.f32 %v1275_v25  ;;  %v3723_v25 = vld [vmem:[#allocation5_spill] sm:$0xff] }
 0x7f2   :  { %2415 = vtanh.f32 %v1279_v2 }
 0x7f3   :  { %2417 = vtanh.f32 %v1273_v54 }
 0x7f4   :  { %2419 = vtanh.f32 %v1284_v62 }
 0x7fb   :  { %v2414_v5 = vpop.eup %2413 }
 0x7fc   :  { %v2416_v7 = vpop.eup %2415  ;;  %v1277_v10 = vadd.f32 1.0, %v2414_v5 }
 0x7fd   :  { %v1281_v57 = vadd.f32 1.0, %v2416_v7  ;;  %v2418_v63 = vpop.eup %2417 }
 0x7fe   :  { %v1278_v15 = vmul.f32 0.5, %v1277_v10  ;;  %v2420_v8 = vpop.eup %2419 }
 0x7ff   :  { %v1282_v6 = vmul.f32 0.5, %v1281_v57  ;;  %v1286_v23 = vadd.f32 1.0, %v2420_v8 }
 0x800   :  { %v1289_v17 = vmul.f32 %v2418_v63, %v1278_v15 }
 0x801   :  { %v1288_v3 = vmul.f32 %v1282_v6, %v3234_v12  ;;  %v1287_v40 = vmul.f32 0.5, %v1286_v23  ;;  %v55_v12 = vld [vmem:[%s3705_s5] sm:$0xf] }
 0x802   :  { %v3491_v51 = vrot.slane %v55_v12, %v3723_v25  ;;  %v3494_v28 = vrot.slane %v55_v12, %v3724_v48  ;;  %v3498_v62 = vrot.slane %v55_v12, %v3725_v52  ;;  %v3726_v23 = vld [vmem:[#allocation7_spill] sm:$0xff] }
 0x803   :  { %v3446_v50 = vadd.f32 %v1289_v17, %v1288_v3 }
 0x805   :  { %2421 = vtanh.f32 %v3446_v50 }
 0x80f   :  { %v2422_v47 = vpop.eup %2421 }
 0x810   :  { %v3449_v22 = vmul.f32 %v2422_v47, %v1287_v40  ;;  %v3503_v40 = vrot.slane %v55_v12, %v3726_v23 }
 0x812   :  { %v1295_v24 = vpack.c.bf16 %v3449_v22, %v3449_v22 }
 0x814   :  { %1489 = vmatmul.mubr.bf16.vlgmr.msra.gmra.mrb[28].mxu0 %v1295_v24  ;;  %1530 = vmatmul.mubr.bf16.vlgmr.msra.gmra.mrb[36].mxu1 %v1295_v24 }
 0x815   :  { %1564 = vmatpush1.bf16.msra.mxu0 %v3257_v29  ;;  %1605 = vmatpush1.bf16.msra.mxu1 %v3262_v14 }
 0x816   :  { %1565 = vmatprep.subr.bf16.mxu0 %v3270_v16  ;;  %1606 = vmatprep.subr.bf16.mxu1 %v3275_v18 }
 0x817   :  { %1595 = vmatprep.mubr.bf16.mxu0 %v3721_v45  ;;  %1636 = vmatprep.mubr.bf16.mxu1 %v3721_v45 }
 0x819   :  { %1566 = vmatpush1.bf16.msra.mxu0 %v3280_v30  ;;  %1607 = vmatpush1.bf16.msra.mxu1 %v3285_v31 }
 0x81a   :  { %1567 = vmatprep.subr.bf16.mxu0 %v3294_v19  ;;  %1608 = vmatprep.subr.bf16.mxu1 %v3299_v32 }
 0x81d   :  { %1568 = vmatpush1.bf16.msra.mxu0 %v3304_v33  ;;  %1609 = vmatpush1.bf16.msra.mxu1 %v3309_v34 }
 0x81e   :  { %1569 = vmatprep.subr.bf16.mxu0 %v3318_v35  ;;  %1610 = vmatprep.subr.bf16.mxu1 %v3323_v36 }
 0x821   :  { %1570 = vmatpush1.bf16.msra.mxu0 %v3328_v37  ;;  %1611 = vmatpush1.bf16.msra.mxu1 %v3333_v38 }
 0x822   :  { %1571 = vmatprep.subr.bf16.mxu0 %v3342_v21  ;;  %1612 = vmatprep.subr.bf16.mxu1 %v3347_v0 }
 0x825   :  { %1572 = vmatpush1.bf16.msra.mxu0 %v3352_v43  ;;  %1613 = vmatpush1.bf16.msra.mxu1 %v3357_v60 }
 0x826   :  { %1573 = vmatprep.subr.bf16.mxu0 %v3366_v42  ;;  %1614 = vmatprep.subr.bf16.mxu1 %v3371_v55 }
 0x829   :  { %1574 = vmatpush1.bf16.msra.mxu0 %v3376_v58  ;;  %1615 = vmatpush1.bf16.msra.mxu1 %v3381_v59 }
 0x82a   :  { %1575 = vmatprep.subr.bf16.mxu0 %v3390_v26  ;;  %1616 = vmatprep.subr.bf16.mxu1 %v3395_v49 }
 0x82d   :  { %1576 = vmatpush1.bf16.msra.mxu0 %v3400_v53  ;;  %1617 = vmatpush1.bf16.msra.mxu1 %v3405_v61 }
 0x82e   :  { %1577 = vmatprep.subr.bf16.mxu0 %v3414_v46  ;;  %1618 = vmatprep.subr.bf16.mxu1 %v3419_v44 }
 0x831   :  { %1578 = vmatpush1.bf16.msra.mxu0 %v3424_v56  ;;  %1619 = vmatpush1.bf16.msra.mxu1 %v3429_v39 }
 0x832   :  { %1670 = vmatprep.subr.bf16.mxu0 %v3246_v4  ;;  %1711 = vmatprep.subr.bf16.mxu1 %v3251_v13 }
 0x8e7   :  { %v1490_v2 = vpop.f32.mrb[28].mxu0  ;;  %v1531_v54 = vpop.f32.mrb[36].mxu1 }
 0x8e8   :  { %v1538_v1 = vadd.f32 %v1490_v2, %v3491_v51  ;;  %v1492_v5 = vpop.f32.mrb[29].mxu0  ;;  %v1533_v7 = vpop.f32.mrb[37].mxu1  ;;  %v1540_v8 = vadd.f32 %v1531_v54, %v3498_v62 }
 0x8e9   :  { %v1539_v10 = vadd.f32 %v1492_v5, %v3494_v28  ;;  %v1494_v57 = vpop.f32.mrb[30].mxu0  ;;  %v1535_v15 = vpop.f32.mrb[38].mxu1  ;;  %v1541_v47 = vadd.f32 %v1533_v7, %v3503_v40 }
 0x8ea   :  { %v1542_v63 = vmul.f32 0.5, %v1538_v1  ;;  %v1495_v6 = vpop.f32.mrb[31].mxu0  ;;  %v1536_v17 = vpop.f32.mrb[39].mxu1 }
 0x8eb   :  { %v1546_v3 = vmul.f32 0.5, %v1539_v10  ;;  %v1551_v24 = vmul.f32 0.5, %v1541_v47 }
 0x8ec   :  { %2423 = vtanh.f32 %v1542_v63 }
 0x8ed   :  { %2425 = vtanh.f32 %v1546_v3 }
 0x8ee   :  { %2427 = vtanh.f32 %v1540_v8 }
 0x8ef   :  { %2429 = vtanh.f32 %v1551_v24 }
 0x8f6   :  { %v2424_v25 = vpop.eup %2423 }
 0x8f7   :  { %v2426_v48 = vpop.eup %2425  ;;  %v1544_v2 = vadd.f32 1.0, %v2424_v25 }
 0x8f8   :  { %v1548_v52 = vadd.f32 1.0, %v2426_v48  ;;  %v2428_v5 = vpop.eup %2427 }
 0x8f9   :  { %v1545_v1 = vmul.f32 0.5, %v1544_v2  ;;  %v2430_v12 = vpop.eup %2429 }
 0x8fa   :  { %v1549_v57 = vmul.f32 0.5, %v1548_v52  ;;  %v1553_v63 = vadd.f32 1.0, %v2430_v12 }
 0x8fb   :  { %v1556_v10 = vmul.f32 %v2428_v5, %v1545_v1 }
 0x8fc   :  { %v1555_v15 = vmul.f32 %v1549_v57, %v3446_v50  ;;  %v1554_v6 = vmul.f32 0.5, %v1553_v63 }
 0x8fe   :  { %v3507_v54 = vadd.f32 %v1556_v10, %v1555_v15 }
 0x900   :  { %2431 = vtanh.f32 %v3507_v54 }
 0x90a   :  { %v2432_v7 = vpop.eup %2431 }
 0x90b   :  { %v3510_v17 = vmul.f32 %v2432_v7, %v1554_v6 }
 0x90d   :  { %v1562_v3 = vpack.c.bf16 %v3510_v17, %v3510_v17 }
 0x90f   :  { %1596 = vmatmul.mubr.bf16.vlgmr.msra.gmra.mrb[32].mxu0 %v1562_v3  ;;  %1637 = vmatmul.mubr.bf16.vlgmr.msra.gmra.mrb[40].mxu1 %v1562_v3 }
 0x910   :  { %1671 = vmatpush1.bf16.msra.mxu0 %v3257_v29  ;;  %1712 = vmatpush1.bf16.msra.mxu1 %v3262_v14 }
 0x911   :  { %1672 = vmatprep.subr.bf16.mxu0 %v3270_v16  ;;  %1713 = vmatprep.subr.bf16.mxu1 %v3275_v18 }
 0x912   :  { %1702 = vmatprep.mubr.bf16.mxu0 %v3721_v45  ;;  %1743 = vmatprep.mubr.bf16.mxu1 %v3721_v45 }
 0x914   :  { %1673 = vmatpush1.bf16.msra.mxu0 %v3280_v30  ;;  %1714 = vmatpush1.bf16.msra.mxu1 %v3285_v31 }
 0x915   :  { %1674 = vmatprep.subr.bf16.mxu0 %v3294_v19  ;;  %1715 = vmatprep.subr.bf16.mxu1 %v3299_v32 }
 0x918   :  { %1675 = vmatpush1.bf16.msra.mxu0 %v3304_v33  ;;  %1716 = vmatpush1.bf16.msra.mxu1 %v3309_v34 }
 0x919   :  { %1676 = vmatprep.subr.bf16.mxu0 %v3318_v35  ;;  %1717 = vmatprep.subr.bf16.mxu1 %v3323_v36 }
 0x91c   :  { %1677 = vmatpush1.bf16.msra.mxu0 %v3328_v37  ;;  %1718 = vmatpush1.bf16.msra.mxu1 %v3333_v38 }
 0x91d   :  { %1678 = vmatprep.subr.bf16.mxu0 %v3342_v21  ;;  %1719 = vmatprep.subr.bf16.mxu1 %v3347_v0 }
 0x920   :  { %1679 = vmatpush1.bf16.msra.mxu0 %v3352_v43  ;;  %1720 = vmatpush1.bf16.msra.mxu1 %v3357_v60 }
 0x921   :  { %1680 = vmatprep.subr.bf16.mxu0 %v3366_v42  ;;  %1721 = vmatprep.subr.bf16.mxu1 %v3371_v55 }
 0x924   :  { %1681 = vmatpush1.bf16.msra.mxu0 %v3376_v58  ;;  %1722 = vmatpush1.bf16.msra.mxu1 %v3381_v59 }
 0x925   :  { %1682 = vmatprep.subr.bf16.mxu0 %v3390_v26  ;;  %1723 = vmatprep.subr.bf16.mxu1 %v3395_v49 }
 0x928   :  { %1683 = vmatpush1.bf16.msra.mxu0 %v3400_v53  ;;  %1724 = vmatpush1.bf16.msra.mxu1 %v3405_v61 }
 0x929   :  { %1684 = vmatprep.subr.bf16.mxu0 %v3414_v46  ;;  %1725 = vmatprep.subr.bf16.mxu1 %v3419_v44 }
 0x92c   :  { %1685 = vmatpush1.bf16.msra.mxu0 %v3424_v56  ;;  %1726 = vmatpush1.bf16.msra.mxu1 %v3429_v39 }
 0x92d   :  { %1777 = vmatprep.subr.bf16.mxu0 %v3246_v4  ;;  %1818 = vmatprep.subr.bf16.mxu1 %v3251_v13 }
 0x9e2   :  { %v1597_v50 = vpop.f32.mrb[32].mxu0  ;;  %v1638_v8 = vpop.f32.mrb[40].mxu1 }
 0x9e3   :  { %v1645_v23 = vadd.f32 %v1597_v50, %v3491_v51  ;;  %v1599_v47 = vpop.f32.mrb[33].mxu0  ;;  %v1640_v24 = vpop.f32.mrb[41].mxu1  ;;  %v1647_v10 = vadd.f32 %v1638_v8, %v3498_v62 }
 0x9e4   :  { %v1646_v25 = vadd.f32 %v1599_v47, %v3494_v28  ;;  %v1601_v48 = vpop.f32.mrb[34].mxu0  ;;  %v1642_v2 = vpop.f32.mrb[42].mxu1  ;;  %v1648_v4 = vadd.f32 %v1640_v24, %v3503_v40 }
 0x9e5   :  { %v1649_v52 = vmul.f32 0.5, %v1645_v23  ;;  %v1602_v1 = vpop.f32.mrb[35].mxu0  ;;  %v1643_v5 = vpop.f32.mrb[43].mxu1 }
 0x9e6   :  { %v1653_v57 = vmul.f32 0.5, %v1646_v25  ;;  %v1658_v13 = vmul.f32 0.5, %v1648_v4  ;;  %v1897_v5 = vld [vmem:[%s3706_s6 + $0x10] sm:$0xff] }
 0x9e7   :  { %2433 = vtanh.f32 %v1649_v52 }
 0x9e8   :  { %2435 = vtanh.f32 %v1653_v57  ;;  %v1898_v57 = vld [vmem:[%s3706_s6 + $0x18] sm:$0xff] }
 0x9e9   :  { %2437 = vtanh.f32 %v1647_v10 }
 0x9ea   :  { %2439 = vtanh.f32 %v1658_v13  ;;  %v2216_v13 = vpack.c.bf16 %v1898_v57, %v1897_v5 }
 0x9f1   :  { %v2434_v15 = vpop.eup %2433 }
 0x9f2   :  { %v2436_v12 = vpop.eup %2435  ;;  %v1651_v63 = vadd.f32 1.0, %v2434_v15  ;;  %v1899_v15 = vld [vmem:[%s3706_s6 + $0x20] sm:$0xff] }
 0x9f3   :  { %v1655_v6 = vadd.f32 1.0, %v2436_v12  ;;  %v2438_v3 = vpop.eup %2437  ;;  %v1900_v12 = vld [vmem:[%s3706_s6 + $0x28] sm:$0xff] }
 0x9f4   :  { %v1652_v7 = vmul.f32 0.5, %v1651_v63  ;;  %v2440_v8 = vpop.eup %2439  ;;  %v3727_v63 = vld [vmem:[#allocation8_spill] sm:$0xff] }
 0x9f5   :  { %v1656_v50 = vmul.f32 0.5, %v1655_v6  ;;  %v1660_v48 = vadd.f32 1.0, %v2440_v8  ;;  %v2220_v6 = vpack.c.bf16 %v1900_v12, %v1899_v15  ;;  %v1905_v8 = vld [vmem:[%s3706_s6 + $0x50] sm:$0xff] }
 0x9f6   :  { %v1663_v23 = vmul.f32 %v2438_v3, %v1652_v7  ;;  %v1901_v7 = vld [vmem:[%s3706_s6 + $0x30] sm:$0xff]  ;;  %v1902_v3 = vld [vmem:[%s3706_s6 + $0x38] sm:$0xff] }
 0x9f7   :  { %v1662_v47 = vmul.f32 %v1656_v50, %v3507_v54  ;;  %v1661_v2 = vmul.f32 0.5, %v1660_v48  ;;  %v2224_v50 = vpack.c.bf16 %v1902_v3, %v1901_v7  ;;  %v1906_v48 = vld [vmem:[%s3706_s6 + $0x58] sm:$0xff] }
 0x9f9   :  { %v3553_v25 = vadd.f32 %v1663_v23, %v1662_v47  ;;  %v1903_v23 = vld [vmem:[%s3706_s6 + $0x40] sm:$0xff]  ;;  %v1904_v47 = vld [vmem:[%s3706_s6 + $0x48] sm:$0xff] }
 0x9fb   :  { %2441 = vtanh.f32 %v3553_v25 }
 0xa05   :  { %v2442_v24 = vpop.eup %2441 }
 0xa06   :  { %v3556_v52 = vmul.f32 %v2442_v24, %v1661_v2  ;;  %v2232_v2 = vpack.c.bf16 %v1906_v48, %v1905_v8  ;;  %v1907_v24 = vld [vmem:[%s3706_s6 + $0x60] sm:$0xff] }
 0xa08   :  { %v1669_v1 = vpack.c.bf16 %v3556_v52, %v3556_v52 }
 0xa0a   :  { %1703 = vmatmul.mubr.bf16.vlgmr.msra.gmra.mrb[36].mxu0 %v1669_v1  ;;  %1744 = vmatmul.mubr.bf16.vlgmr.msra.gmra.mrb[44].mxu1 %v1669_v1  ;;  %v1908_v1 = vld [vmem:[%s3706_s6 + $0x68] sm:$0xff] }
 0xa0b   :  { %1778 = vmatpush1.bf16.msra.mxu0 %v3257_v29  ;;  %1819 = vmatpush1.bf16.msra.mxu1 %v3262_v14  ;;  %v1896_v29 = vld [vmem:[%s3706_s6 + $0x8] sm:$0xff] }
 0xa0c   :  { %1779 = vmatprep.subr.bf16.mxu0 %v3270_v16  ;;  %1820 = vmatprep.subr.bf16.mxu1 %v3275_v18 }
 0xa0d   :  { %1809 = vmatprep.mubr.bf16.mxu0 %v3721_v45  ;;  %1850 = vmatprep.mubr.bf16.mxu1 %v3721_v45  ;;  %v1895_v45 = vld [vmem:[%s3706_s6] sm:$0xff] }
 0xa0e   :  { %v2212_v14 = vpack.c.bf16 %v1896_v29, %v1895_v45  ;;  %v2236_v45 = vpack.c.bf16 %v1908_v1, %v1907_v24  ;;  %v1909_v29 = vld [vmem:[%s3706_s6 + $0x70] sm:$0xff] }
 0xa0f   :  { %1780 = vmatpush1.bf16.msra.mxu0 %v3280_v30  ;;  %1821 = vmatpush1.bf16.msra.mxu1 %v3285_v31 }
 0xa10   :  { %1781 = vmatprep.subr.bf16.mxu0 %v3294_v19  ;;  %1822 = vmatprep.subr.bf16.mxu1 %v3299_v32 }
 0xa13   :  { %1782 = vmatpush1.bf16.msra.mxu0 %v3304_v33  ;;  %1823 = vmatpush1.bf16.msra.mxu1 %v3309_v34 }
 0xa14   :  { %1783 = vmatprep.subr.bf16.mxu0 %v3318_v35  ;;  %1824 = vmatprep.subr.bf16.mxu1 %v3323_v36 }
 0xa17   :  { %1784 = vmatpush1.bf16.msra.mxu0 %v3328_v37  ;;  %1825 = vmatpush1.bf16.msra.mxu1 %v3333_v38 }
 0xa18   :  { %1785 = vmatprep.subr.bf16.mxu0 %v3342_v21  ;;  %1826 = vmatprep.subr.bf16.mxu1 %v3347_v0 }
 0xa1b   :  { %1786 = vmatpush1.bf16.msra.mxu0 %v3352_v43  ;;  %1827 = vmatpush1.bf16.msra.mxu1 %v3357_v60 }
 0xa1c   :  { %1787 = vmatprep.subr.bf16.mxu0 %v3366_v42  ;;  %1828 = vmatprep.subr.bf16.mxu1 %v3371_v55 }
 0xa1f   :  { %1788 = vmatpush1.bf16.msra.mxu0 %v3376_v58  ;;  %1829 = vmatpush1.bf16.msra.mxu1 %v3381_v59 }
 0xa20   :  { %1789 = vmatprep.subr.bf16.mxu0 %v3390_v26  ;;  %1830 = vmatprep.subr.bf16.mxu1 %v3395_v49 }
 0xa23   :  { %1790 = vmatpush1.bf16.msra.mxu0 %v3400_v53  ;;  %1831 = vmatpush1.bf16.msra.mxu1 %v3405_v61 }
 0xa24   :  { %1791 = vmatprep.subr.bf16.mxu0 %v3414_v46  ;;  %1832 = vmatprep.subr.bf16.mxu1 %v3419_v44 }
 0xa27   :  { %1792 = vmatpush1.bf16.msra.mxu0 %v3424_v56  ;;  %1833 = vmatpush1.bf16.msra.mxu1 %v3429_v39 }
 0xa28   :  { %2213 = vmatprep.subr.bf16.mxu0 %v2212_v14 }
 0xadd   :  { %v1704_v16 = vpop.f32.mrb[36].mxu0  ;;  %v1745_v18 = vpop.f32.mrb[44].mxu1 }
 0xade   :  { %v1752_v30 = vadd.f32 %v1704_v16, %v3491_v51  ;;  %v1706_v31 = vpop.f32.mrb[37].mxu0  ;;  %v1747_v19 = vpop.f32.mrb[45].mxu1  ;;  %v1754_v21 = vadd.f32 %v1745_v18, %v3498_v62  ;;  %v3728_v18 = vld [vmem:[#allocation9_spill] sm:$0xff] }
 0xadf   :  { %v1753_v32 = vadd.f32 %v1706_v31, %v3494_v28  ;;  %v1708_v33 = vpop.f32.mrb[38].mxu0  ;;  %v1749_v34 = vpop.f32.mrb[46].mxu1  ;;  %v1755_v0 = vadd.f32 %v1747_v19, %v3503_v40 }
 0xae0   :  { %v1756_v35 = vmul.f32 0.5, %v1752_v30  ;;  %v1709_v36 = vpop.f32.mrb[39].mxu0  ;;  %v1750_v37 = vpop.f32.mrb[47].mxu1 }
 0xae1   :  { %v1760_v38 = vmul.f32 0.5, %v1753_v32  ;;  %v1765_v43 = vmul.f32 0.5, %v1755_v0 }
 0xae2   :  { %2443 = vtanh.f32 %v1756_v35 }
 0xae3   :  { %2445 = vtanh.f32 %v1760_v38 }
 0xae4   :  { %2447 = vtanh.f32 %v1754_v21 }
 0xae5   :  { %2449 = vtanh.f32 %v1765_v43 }
 0xaec   :  { %v2444_v60 = vpop.eup %2443 }
 0xaed   :  { %v2446_v42 = vpop.eup %2445  ;;  %v1758_v55 = vadd.f32 1.0, %v2444_v60 }
 0xaee   :  { %v1762_v58 = vadd.f32 1.0, %v2446_v42  ;;  %v2448_v26 = vpop.eup %2447 }
 0xaef   :  { %v1759_v59 = vmul.f32 0.5, %v1758_v55  ;;  %v2450_v44 = vpop.eup %2449 }
 0xaf0   :  { %v1763_v49 = vmul.f32 0.5, %v1762_v58  ;;  %v1767_v56 = vadd.f32 1.0, %v2450_v44  ;;  %v1919_v58 = vpop.permute.xlu0 %1918 }
 0xaf1   :  { %v1770_v53 = vmul.f32 %v2448_v26, %v1759_v59 }
 0xaf2   :  { %v1769_v61 = vmul.f32 %v1763_v49, %v3553_v25  ;;  %v1768_v39 = vmul.f32 0.5, %v1767_v56  ;;  %v2228_v25 = vpack.c.bf16 %v1904_v47, %v1903_v23 }
 0xaf4   :  { %v3603_v46 = vadd.f32 %v1770_v53, %v1769_v61 }
 0xaf6   :  { %2451 = vtanh.f32 %v3603_v46 }
 0xb00   :  { %v2452_v54 = vpop.eup %2451 }
 0xb01   :  { %v1773_v10 = vmul.f32 %v2452_v54, %v1768_v39 }
 0xb03   :  { %v1776_v4 = vpack.c.bf16 %v1773_v10, %v1773_v10 }
 0xb05   :  { %1810 = vmatmul.mubr.bf16.vlgmr.msra.gmra.mrb[40].mxu0 %v1776_v4  ;;  %1851 = vmatmul.mubr.bf16.vlgmr.msra.gmra.mrb[48].mxu1 %v1776_v4 }
 0xb06   :  { %2215 = vmatpush3.bf16.msra.mxu0 %v2212_v14  ;;  %2194 = vmatprep.mubr.f32.mxu0 %v3727_v63  ;;  %v1910_v14 = vld [vmem:[%s3706_s6 + $0x78] sm:$0xff] }
 0xb07   :  { %2217 = vmatprep.subr.bf16.mxu0 %v2216_v13  ;;  %v2240_v16 = vpack.c.bf16 %v1910_v14, %v1909_v29 }
 0xb0a   :  { %2219 = vmatpush3.bf16.msra.mxu0 %v2216_v13 }
 0xb0b   :  { %2221 = vmatprep.subr.bf16.mxu0 %v2220_v6 }
 0xb0e   :  { %2223 = vmatpush3.bf16.msra.mxu0 %v2220_v6 }
 0xb0f   :  { %2225 = vmatprep.subr.bf16.mxu0 %v2224_v50 }
 0xb12   :  { %2227 = vmatpush3.bf16.msra.mxu0 %v2224_v50 }
 0xb13   :  { %2229 = vmatprep.subr.bf16.mxu0 %v2228_v25 }
 0xb16   :  { %2231 = vmatpush3.bf16.msra.mxu0 %v2228_v25 }
 0xb17   :  { %2233 = vmatprep.subr.bf16.mxu0 %v2232_v2 }
 0xb1a   :  { %2235 = vmatpush3.bf16.msra.mxu0 %v2232_v2 }
 0xb1b   :  { %2237 = vmatprep.subr.bf16.mxu0 %v2236_v45 }
 0xb1e   :  { %2239 = vmatpush3.bf16.msra.mxu0 %v2236_v45 }
 0xb1f   :  { %2241 = vmatprep.subr.bf16.mxu0 %v2240_v16 }
 0xb22   :  { %2243 = vmatpush3.bf16.msra.mxu0 %v2240_v16 }
 0xb25   :  { %2195 = vmatmul.mubr.f32.vlgmr.msra.gmra.mrb[44].mxu0 %v3728_v18 }
 0xb26   :  { %2197 = vmatprep.mubr.f32.mxu0 %v2950_v41 }
 0xb29   :  { %2198 = vmatmul.mubr.f32.gmra.mrb[46].mxu0 %v3000_v20 }
 0xb2a   :  { %2200 = vmatprep.mubr.f32.mxu0 %v3050_v11 }
 0xb2d   :  { %2201 = vmatmul.mubr.f32.gmra.mrb[48].mxu0 %v3147_v9 }
 0xb2e   :  { %2203 = vmatprep.mubr.f32.mxu0 %v3237_v27 }
 0xb31   :  { %2204 = vmatmul.mubr.f32.gmra.mrb[50].mxu0 %v3449_v22 }
 0xb32   :  { %2206 = vmatprep.mubr.f32.mxu0 %v3510_v17 }
 0xb35   :  { %2207 = vmatmul.mubr.f32.gmra.mrb[52].mxu0 %v3556_v52 }
 0xb36   :  { %2209 = vmatprep.mubr.f32.mxu0 %v1773_v10 }
 0xbd8   :  { %v1811_v30 = vpop.f32.mrb[40].mxu0  ;;  %v1852_v31 = vpop.f32.mrb[48].mxu1 }
 0xbd9   :  { %v1859_v19 = vadd.f32 %v1811_v30, %v3491_v51  ;;  %v1813_v41 = vpop.f32.mrb[41].mxu0  ;;  %v1854_v32 = vpop.f32.mrb[49].mxu1  ;;  %v1861_v22 = vadd.f32 %v1852_v31, %v3498_v62 }
 0xbda   :  { %v1860_v20 = vadd.f32 %v1813_v41, %v3494_v28  ;;  %v1815_v11 = vpop.f32.mrb[42].mxu0  ;;  %v1856_v33 = vpop.f32.mrb[50].mxu1  ;;  %v1862_v17 = vadd.f32 %v1854_v32, %v3503_v40 }
 0xbdb   :  { %v1863_v9 = vmul.f32 0.5, %v1859_v19  ;;  %v1816_v34 = vpop.f32.mrb[43].mxu0  ;;  %v1857_v27 = vpop.f32.mrb[51].mxu1 }
 0xbdc   :  { %v1867_v35 = vmul.f32 0.5, %v1860_v20  ;;  %v1872_v52 = vmul.f32 0.5, %v1862_v17 }
 0xbdd   :  { %2453 = vtanh.f32 %v1863_v9 }
 0xbde   :  { %2455 = vtanh.f32 %v1867_v35 }
 0xbdf   :  { %2457 = vtanh.f32 %v1861_v22 }
 0xbe0   :  { %2459 = vtanh.f32 %v1872_v52 }
 0xbe7   :  { %v2454_v36 = vpop.eup %2453 }
 0xbe8   :  { %v2456_v51 = vpop.eup %2455  ;;  %v1865_v37 = vadd.f32 1.0, %v2454_v36 }
 0xbe9   :  { %v1869_v38 = vadd.f32 1.0, %v2456_v51  ;;  %v2458_v21 = vpop.eup %2457 }
 0xbea   :  { %v1866_v28 = vmul.f32 0.5, %v1865_v37  ;;  %v2460_v55 = vpop.eup %2459 }
 0xbeb   :  { %v1870_v0 = vmul.f32 0.5, %v1869_v38  ;;  %v1874_v62 = vadd.f32 1.0, %v2460_v55 }
 0xbec   :  { %v1877_v43 = vmul.f32 %v2458_v21, %v1866_v28 }
 0xbed   :  { %v1876_v60 = vmul.f32 %v1870_v0, %v3603_v46  ;;  %v1875_v49 = vmul.f32 0.5, %v1874_v62 }
 0xbef   :  { %v1878_v42 = vadd.f32 %v1877_v43, %v1876_v60 }
 0xbf1   :  { %2461 = vtanh.f32 %v1878_v42 }
 0xbf8   :  { %v2196_v59 = vpop.f32.mrb[44].mxu0 }
 0xbf9   :  { %v1993_v26 = vadd.f32 %v2196_v59, %v1919_v58  ;;  %v1987_v40 = vpop.f32.mrb[45].mxu0 }
 0xbfa   :  { %v1988_v53 = vadd.f32 %v1987_v40, %v1919_v58 }
 0xbfb   :  { %v2462_v61 = vpop.eup %2461  ;;  %2047 = vst [vmem:[%s3707_s8 + $0x8] sm:$0xff] %v1993_v26 }
 0xbfc   :  { %2046 = vst [vmem:[%s3707_s8] sm:$0xff] %v1988_v53  ;;  %v2199_v46 = vpop.f32.mrb[46].mxu0  ;;  %v1880_v44 = vmul.f32 %v2462_v61, %v1875_v49 }
 0xbfd   :  { %v2003_v56 = vadd.f32 %v2199_v46, %v1919_v58  ;;  %v1997_v39 = vpop.f32.mrb[47].mxu0 }
 0xbfe   :  { %v1998_v54 = vadd.f32 %v1997_v39, %v1919_v58  ;;  %2210 = vmatmul.mubr.f32.gmra.mrb[54].mxu0 %v1880_v44 }
 0xbff   :  { %2049 = vst [vmem:[%s3707_s8 + $0x18] sm:$0xff] %v2003_v56 }
 0xc00   :  { %2048 = vst [vmem:[%s3707_s8 + $0x10] sm:$0xff] %v1998_v54  ;;  %v2202_v5 = vpop.f32.mrb[48].mxu0 }
 0xc01   :  { %v2013_v57 = vadd.f32 %v2202_v5, %v1919_v58  ;;  %v2007_v10 = vpop.f32.mrb[49].mxu0 }
 0xc02   :  { %v2008_v4 = vadd.f32 %v2007_v10, %v1919_v58 }
 0xc03   :  { %2051 = vst [vmem:[%s3707_s8 + $0x28] sm:$0xff] %v2013_v57 }
 0xc04   :  { %2050 = vst [vmem:[%s3707_s8 + $0x20] sm:$0xff] %v2008_v4  ;;  %v2205_v13 = vpop.f32.mrb[50].mxu0 }
 0xc05   :  { %v2023_v15 = vadd.f32 %v2205_v13, %v1919_v58  ;;  %v2017_v12 = vpop.f32.mrb[51].mxu0 }
 0xc06   :  { %v2018_v63 = vadd.f32 %v2017_v12, %v1919_v58 }
 0xc07   :  { %2053 = vst [vmem:[%s3707_s8 + $0x38] sm:$0xff] %v2023_v15 }
 0xc08   :  { %2052 = vst [vmem:[%s3707_s8 + $0x30] sm:$0xff] %v2018_v63  ;;  %v2208_v6 = vpop.f32.mrb[52].mxu0 }
 0xc09   :  { %v2033_v7 = vadd.f32 %v2208_v6, %v1919_v58  ;;  %v2027_v3 = vpop.f32.mrb[53].mxu0 }
 0xc0a   :  { %v2028_v50 = vadd.f32 %v2027_v3, %v1919_v58 }
 0xc0b   :  { %2055 = vst [vmem:[%s3707_s8 + $0x48] sm:$0xff] %v2033_v7 }
 0xc0c   :  { %2054 = vst [vmem:[%s3707_s8 + $0x40] sm:$0xff] %v2028_v50 }
 0xcd1   :  { %v2211_v23 = vpop.f32.mrb[54].mxu0 }
 0xcd2   :  { %v2043_v47 = vadd.f32 %v2211_v23, %v1919_v58  ;;  %v2037_v25 = vpop.f32.mrb[55].mxu0 }
 0xcd3   :  { %v2038_v8 = vadd.f32 %v2037_v25, %v1919_v58 }
 0xcd4   :  { %2057 = vst [vmem:[%s3707_s8 + $0x58] sm:$0xff] %v2043_v47 }
 0xcd5   :  { %2056 = vst [vmem:[%s3707_s8 + $0x50] sm:$0xff] %v2038_v8 }

</bundles_post_ra>
